<compile_context>
chip_gen: v5e
topology: v5e:2x2
jax: 0.10.0
libtpu: 0.0.40
codegen_flags: <defaults>
</compile_context>

<pallas_src>
import functools

import jax
import jax.numpy as jnp
from jax.experimental import pallas as pl
from jax.experimental.pallas import tpu as pltpu

EPS = 1e-5
KH = KW = 3          # kernel_size = 3, padding = 1, stride = 1
LANE = 128
APRON = 128          # lane-tile-aligned zero apron for static tap shifts


def _vmem_capacity_bytes():
    """Per-core VMEM capacity; conservative fallback (v7x size) if the query
    is unavailable."""
    try:
        return int(pltpu.get_tpu_info().vmem_capacity_bytes)
    except Exception:
        return 64 * 1024 * 1024


def _pick_band(H, W, max_band_lanes):
    """Largest row-band that divides H, has a 128-multiple lane width and fits
    the per-band lane budget.  Falls back to the full image (nb == 1)."""
    best = H
    for band in range(1, H):
        if H % band == 0 and (band * W) % LANE == 0 and band * W <= max_band_lanes:
            best = band
    if best == H:
        return H, 1
    return best, H // best


def _conv3x3_band(xin, w_ref, band, W):
    """3x3 / pad-1 conv of `band` output rows as 3 accumulated GEMMs.

    xin  : (C, (band+2)*W) f32 — input rows [r0-1, r0+band+1); halo rows that
           fall outside the image hold zeros (conv zero padding).
    w_ref: (C, 9*C) bf16 ref — rows = out channel, cols tap-major (kh, kw),
           in-channel minor.
    Returns (C, band*W) f32 — conv output rows [r0, r0+band).
    """
    C = xin.shape[0]
    out_len = band * W
    zeros = jnp.zeros((C, APRON), xin.dtype)
    xp = jnp.concatenate([zeros, xin, zeros], axis=1)      # lane apron

    col = jax.lax.broadcasted_iota(jnp.int32, (1, out_len), 1) % W
    ok_left = col >= 1            # tap column c-1 inside the image row
    ok_right = col <= W - 2       # tap column c+1 inside the image row

    acc = jnp.zeros((C, out_len), jnp.float32)
    for kh in range(KH):          # one accumulated GEMM per kernel row
        taps = []
        for kw in range(KW):
            dw = kw - 1
            off = kh * W + dw     # xin offset of this tap for output pixel 0
            t = jax.lax.slice(xp, (0, APRON + off), (C, APRON + off + out_len))
            if dw == -1:
                t = jnp.where(ok_left, t, 0.0)    # f32 select (v5e-safe)
            elif dw == 1:
                t = jnp.where(ok_right, t, 0.0)
            taps.append(t.astype(jnp.bfloat16))   # cast late: halves slab VMEM
        slab = jnp.concatenate(taps, axis=0)                    # (3C, band*W)
        w_row = w_ref[:, kh * KW * C:(kh + 1) * KW * C]          # (C, 3C) bf16
        acc = acc + jnp.dot(w_row, slab, preferred_element_type=jnp.float32)
    return acc


def _band_window(img_ref, b, transform, *, nb, band, W, HW):
    """Gather the (band+2)-row window (1-row halo) of band `b` from the
    resident full-image block `img_ref` ((1, C, HW)).  All dynamic lane slices
    use 128-aligned starts / 128-multiple lengths.  `transform` maps raw
    loaded rows to f32 conv-input rows (identity, or BN+ReLU for conv2); halo
    rows outside the image are zeroed AFTER the transform (conv zero pad)."""
    C = img_ref.shape[1]
    bw = band * W
    if nb == 1:
        zero = jnp.zeros((C, W), jnp.float32)
        return jnp.concatenate([zero, transform(img_ref[0]), zero], axis=1)

    halo = ((W + LANE - 1) // LANE) * LANE       # >= one image row, 128-aligned

    start = pl.multiple_of(b * bw, LANE)
    mid = transform(img_ref[0, :, pl.ds(start, bw)])

    # top halo: last W lanes of the aligned window ending at b*bw (row r0-1)
    t_start = pl.multiple_of(jnp.maximum(b * bw - halo, 0), LANE)
    top_win = transform(img_ref[0, :, pl.ds(t_start, halo)])
    top = jax.lax.slice(top_win, (0, halo - W), (C, halo))
    top = jnp.where(b == 0, 0.0, top)

    # bottom halo: first W lanes of the aligned window at (b+1)*bw (row r0+band)
    b_start = pl.multiple_of(jnp.minimum((b + 1) * bw, HW - halo), LANE)
    bot_win = transform(img_ref[0, :, pl.ds(b_start, halo)])
    bot = jax.lax.slice(bot_win, (0, 0), (C, W))
    bot = jnp.where(b == nb - 1, 0.0, bot)

    return jnp.concatenate([top, mid, bot], axis=1)


def _conv1_kernel(x_ref, w_ref, y_ref, s_ref, ss_ref, *, nb, band, W, HW):
    """Pass 1: y1 = conv1(x) for one row-band + per-band channel sum/sumsq."""
    b = pl.program_id(1)
    xin = _band_window(x_ref, b, lambda v: v.astype(jnp.float32),
                       nb=nb, band=band, W=W, HW=HW)
    y = _conv3x3_band(xin, w_ref, band, W)
    s_ref[0, 0] = jnp.sum(y, axis=1, keepdims=True)
    ss_ref[0, 0] = jnp.sum(y * y, axis=1, keepdims=True)
    y_ref[0] = y.astype(y_ref.dtype)


def _conv2_kernel(y1_ref, w_ref, sc_ref, sh_ref, y2_ref, s_ref, ss_ref, *,
                  nb, band, W, HW):
    """Pass 2: y2 = conv2(relu(bn1(y1))) for one row-band + per-band sums."""
    b = pl.program_id(1)
    scale = sc_ref[...]
    shift = sh_ref[...]

    def bn_relu(v):
        return jnp.maximum(v.astype(jnp.float32) * scale + shift, 0.0)

    hin = _band_window(y1_ref, b, bn_relu, nb=nb, band=band, W=W, HW=HW)
    y = _conv3x3_band(hin, w_ref, band, W)
    s_ref[0, 0] = jnp.sum(y, axis=1, keepdims=True)
    ss_ref[0, 0] = jnp.sum(y * y, axis=1, keepdims=True)
    y2_ref[0] = y.astype(y2_ref.dtype)


def _out_kernel(y2_ref, x_ref, sc_ref, sh_ref, out_ref):
    """Pass 3: out = relu(bn2(y2)) + x (residual added after the ReLU)."""
    o = jnp.maximum(y2_ref[0].astype(jnp.float32) * sc_ref[...] + sh_ref[...], 0.0)
    out_ref[0] = o + x_ref[0]


def _bn_scale_shift(s, ss, gamma, beta, m_total, CP):
    """Fold training-mode BatchNorm into per-channel scale/shift (tiny XLA op).
    One-pass E[x^2]-E[x]^2 variance in f32, clamped at 0 (see review note)."""
    f32 = jnp.float32
    tot = jnp.sum(s, axis=(0, 1))                          # (CP, 1)
    tot_sq = jnp.sum(ss, axis=(0, 1))
    mean = tot / m_total
    var = jnp.maximum(tot_sq / m_total - mean * mean, 0.0)
    g = jnp.pad(gamma.astype(f32), (0, CP - gamma.shape[0])).reshape(CP, 1)
    b = jnp.pad(beta.astype(f32), (0, CP - beta.shape[0])).reshape(CP, 1)
    scale = g * jax.lax.rsqrt(var + EPS)
    return scale, b - mean * scale


@jax.jit
def residual_block_forward(x_nchw, w1_oihw, g1, b1, w2_oihw, g2, b2):
    """ResidualBlock forward: NCHW in / NCHW out, PyTorch parameter layouts."""
    N, C, H, W = x_nchw.shape
    Cout = w1_oihw.shape[0]
    if Cout != C:
        # TODO(synk): stride != 1 / Cin != Cout downsample path not implemented.
        raise NotImplementedError("identity residual requires Cin == Cout")
    HW = H * W
    CP = ((C + 7) // 8) * 8                  # channel pad to the sublane tile
    m_total = float(N * H * W)
    f32 = jnp.float32

    vmem_cap = _vmem_capacity_bytes()
    # v7x (64 MiB/core) gets ~half-size row bands vs v5e/v6e (128 MiB).
    max_band_lanes = 8192 if vmem_cap >= 96 * 1024 * 1024 else 4096
    band, nb = _pick_band(H, W, max_band_lanes)
    bw = band * W

    # ---- glue: free reshape to (N, C, HW); pad channels to CP ----------------
    x = x_nchw.reshape(N, C, HW).astype(f32)
    if CP != C:
        x = jnp.pad(x, ((0, 0), (0, CP - C), (0, 0)))

    def prep_w(w_oihw):
        # OIHW -> (CP, 9*CP): rows = out channel, cols tap-major / chan-minor.
        w = jnp.transpose(w_oihw, (0, 2, 3, 1))                   # (O,KH,KW,I)
        w = jnp.pad(w, ((0, CP - Cout), (0, 0), (0, 0), (0, CP - C)))
        return w.reshape(CP, KH * KW * CP).astype(jnp.bfloat16)

    w1m, w2m = prep_w(w1_oihw), prep_w(w2_oihw)

    # ---- specs ----------------------------------------------------------------
    grid = (N, nb)                                     # batch x row-band
    # Conv input: full image, resident across the (inner) band axis.
    img_spec = pl.BlockSpec((1, CP, HW), lambda n, b: (n, 0, 0))
    band_spec = pl.BlockSpec((1, CP, bw), lambda n, b: (n, 0, b))
    stat_spec = pl.BlockSpec((1, 1, CP, 1), lambda n, b: (n, b, 0, 0))
    # TODO(synk): confirm this grid-invariant weight block stays resident.
    w_spec = pl.BlockSpec((CP, KH * KW * CP), lambda n, b: (0, 0))
    vec_spec = pl.BlockSpec((CP, 1), lambda n, b: (0, 0))

    y_bf16 = jax.ShapeDtypeStruct((N, CP, HW), jnp.bfloat16)
    stat_f32 = jax.ShapeDtypeStruct((N, nb, CP, 1), f32)

    # vmem_limit from the estimated per-step footprint (2x safety margin).
    per_band = CP * (bw + 2 * W + 2 * APRON) * 4 * 2   # window + apron copy f32
    per_band += 3 * CP * bw * 2 * 2                    # bf16 tap slab (+ temp)
    per_band += CP * bw * 4 * 2                        # f32 accumulator + epilogue
    blocks = 2 * CP * HW * 4 + 2 * CP * bw * 4         # in/out double buffers
    blocks += 2 * CP * KH * KW * CP * 2                # weights
    vmem_limit = int(min(0.9 * vmem_cap,
                         max(2 * (per_band + blocks), 32 * 1024 * 1024)))
    params = pltpu.CompilerParams(
        dimension_semantics=("parallel", "parallel"),
        vmem_limit_bytes=vmem_limit)

    # ---- pass 1: conv1 + per-band stats ----------------------------------------
    y1, s1, ss1 = pl.pallas_call(
        functools.partial(_conv1_kernel, nb=nb, band=band, W=W, HW=HW),
        grid=grid,
        in_specs=[img_spec, w_spec],
        out_specs=(band_spec, stat_spec, stat_spec),
        out_shape=(y_bf16, stat_f32, stat_f32),
        compiler_params=params,
    )(x, w1m)

    # BN1 fold: one tiny XLA op, hoisted out of the per-band grid.
    sc1, sh1 = _bn_scale_shift(s1, ss1, g1, b1, m_total, CP)

    # ---- pass 2: BN1 + ReLU + conv2 + per-band stats ----------------------------
    y2, s2, ss2 = pl.pallas_call(
        functools.partial(_conv2_kernel, nb=nb, band=band, W=W, HW=HW),
        grid=grid,
        in_specs=[img_spec, w_spec, vec_spec, vec_spec],
        out_specs=(band_spec, stat_spec, stat_spec),
        out_shape=(y_bf16, stat_f32, stat_f32),
        compiler_params=params,
    )(y1, w2m, sc1, sh1)

    sc2, sh2 = _bn_scale_shift(s2, ss2, g2, b2, m_total, CP)

    # ---- pass 3: BN2 + ReLU + residual add --------------------------------------
    out = pl.pallas_call(
        _out_kernel,
        grid=grid,
        in_specs=[band_spec, band_spec, vec_spec, vec_spec],
        out_specs=band_spec,
        out_shape=jax.ShapeDtypeStruct((N, CP, HW), f32),
        compiler_params=params,
    )(y2, x, sc2, sh2)

    if CP != C:
        out = out[:, :C, :]
    return out.reshape(N, C, H, W)


def _reference_forward(x, w1, g1, b1, w2, g2, b2, matmul_dtype=jnp.float32):
    """Pure-JAX reference (NCHW).  matmul_dtype=bf16 mirrors the kernel's MXU
    operand precision (f32 accumulation)."""
    dn = ('NCHW', 'OIHW', 'NCHW')

    def conv(inp, w):
        return jax.lax.conv_general_dilated(
            inp.astype(matmul_dtype), w.astype(matmul_dtype), (1, 1),
            ((1, 1), (1, 1)), dimension_numbers=dn,
            preferred_element_type=jnp.float32,
            precision=jax.lax.Precision.HIGHEST)

    def bn(y, g, b):
        m = jnp.mean(y, axis=(0, 2, 3), keepdims=True)
        v = jnp.mean((y - m) ** 2, axis=(0, 2, 3), keepdims=True)
        return ((y - m) * jax.lax.rsqrt(v + EPS) * g.reshape(1, -1, 1, 1)
                + b.reshape(1, -1, 1, 1))

    h = jnp.maximum(bn(conv(x, w1), g1, b1), 0.0)
    o = jnp.maximum(bn(conv(h, w2), g2, b2), 0.0)
    return o + x


if __name__ == "__main__":
    # ResidualBlock(in_channels=4, out_channels=4, kernel_size=3, padding=1,
    #               stride=1).  NOTE: toy shapes are for correctness only; do
    # not benchmark/tune here (per review) — use real ResNet stage shapes.
    N, C, H, W = 2, 4, 16, 16          # -> band=8, nb=2: exercises halo path

    key = jax.random.PRNGKey(0)
    kx, kw1, kw2, kg1, kb1, kg2, kb2 = jax.random.split(key, 7)

    x = jax.random.normal(kx, (N, C, H, W), jnp.float32)
    w1 = 0.1 * jax.random.normal(kw1, (C, C, KH, KW), jnp.float32)   # OIHW
    w2 = 0.1 * jax.random.normal(kw2, (C, C, KH, KW), jnp.float32)   # OIHW
    g1 = 1.0 + 0.1 * jax.random.normal(kg1, (C,), jnp.float32)
    b1 = 0.1 * jax.random.normal(kb1, (C,), jnp.float32)
    g2 = 1.0 + 0.1 * jax.random.normal(kg2, (C,), jnp.float32)
    b2 = 0.1 * jax.random.normal(kb2, (C,), jnp.float32)

    out = jax.block_until_ready(residual_block_forward(x, w1, g1, b1, w2, g2, b2))
    assert out.shape == (N, C, H, W)

    # Check vs a reference with the same bf16 MXU operand precision.  The
    # kernel additionally stores y1/y2 as bf16 between passes, so tolerances
    # are looser than a pure-f32 comparison (structural errors are O(1)).
    ref_bf16 = _reference_forward(x, w1, g1, b1, w2, g2, b2,
                                  matmul_dtype=jnp.bfloat16)
    err = float(jnp.max(jnp.abs(out - ref_bf16)))
    assert err < 5e-2, f"max abs err vs bf16-matmul reference = {err}"

    ref_f32 = _reference_forward(x, w1, g1, b1, w2, g2, b2,
                                 matmul_dtype=jnp.float32)
    err32 = float(jnp.max(jnp.abs(out - ref_f32)))
    assert err32 < 7e-2, f"max abs err vs f32 reference = {err32}"

    print("KERNEL_OK")
</pallas_src>

<mosaic_0001>
module attributes {stable_mosaic.version = 11 : i64} {
  func.func @_out_kernel(%arg0: i32, %arg1: i32, %arg2: memref<1x8x128xbf16, #tpu.memory_space<vmem>>, %arg3: memref<1x8x128xf32, #tpu.memory_space<vmem>>, %arg4: memref<8x1xf32, #tpu.memory_space<vmem>>, %arg5: memref<8x1xf32, #tpu.memory_space<vmem>>, %arg6: memref<1x8x128xf32, #tpu.memory_space<vmem>>) attributes {dimension_semantics = [#tpu.dimension_semantics<parallel>, #tpu.dimension_semantics<parallel>], iteration_bounds = array<i64: 2, 2>, scalar_prefetch = 0 : i64, scratch_operands = 0 : i64, tpu.core_type = #tpu.core_type<tc>, window_params = [{transform_indices = @transform_0, window_bounds = array<i64: 1, 8, 128>}, {transform_indices = @transform_1, window_bounds = array<i64: 1, 8, 128>}, {pipeline_mode = #tpu.pipeline_mode<synchronous>, transform_indices = @transform_2, window_bounds = array<i64: 8, 1>}, {pipeline_mode = #tpu.pipeline_mode<synchronous>, transform_indices = @transform_3, window_bounds = array<i64: 8, 1>}, {transform_indices = @transform_4, window_bounds = array<i64: 1, 8, 128>}]} {
    %c0 = arith.constant 0 : index
    %c0_0 = arith.constant 0 : index
    %c0_1 = arith.constant 0 : index
    %0 = vector.load %arg2[%c0, %c0_0, %c0_1] : memref<1x8x128xbf16, #tpu.memory_space<vmem>>, vector<1x8x128xbf16>
    %1 = vector.shape_cast %0 : vector<1x8x128xbf16> to vector<8x128xbf16>
    %2 = arith.extf %1 : vector<8x128xbf16> to vector<8x128xf32>
    %c0_2 = arith.constant 0 : index
    %c0_3 = arith.constant 0 : index
    %3 = vector.load %arg4[%c0_2, %c0_3] : memref<8x1xf32, #tpu.memory_space<vmem>>, vector<8x1xf32>
    %4 = vector.broadcast %3 : vector<8x1xf32> to vector<8x128xf32>
    %5 = arith.mulf %2, %4 : vector<8x128xf32>
    %c0_4 = arith.constant 0 : index
    %c0_5 = arith.constant 0 : index
    %6 = vector.load %arg5[%c0_4, %c0_5] : memref<8x1xf32, #tpu.memory_space<vmem>>, vector<8x1xf32>
    %7 = vector.broadcast %6 : vector<8x1xf32> to vector<8x128xf32>
    %8 = arith.addf %5, %7 : vector<8x128xf32>
    %cst = arith.constant 0.000000e+00 : f32
    %9 = vector.broadcast %cst : f32 to vector<8x128xf32>
    %10 = arith.maximumf %8, %9 : vector<8x128xf32>
    %c0_6 = arith.constant 0 : index
    %c0_7 = arith.constant 0 : index
    %c0_8 = arith.constant 0 : index
    %11 = vector.load %arg3[%c0_6, %c0_7, %c0_8] : memref<1x8x128xf32, #tpu.memory_space<vmem>>, vector<1x8x128xf32>
    %12 = vector.shape_cast %11 : vector<1x8x128xf32> to vector<8x128xf32>
    %13 = arith.addf %10, %12 : vector<8x128xf32>
    %c0_9 = arith.constant 0 : index
    %c0_10 = arith.constant 0 : index
    %c0_11 = arith.constant 0 : index
    %14 = vector.load %arg6[%c0_9, %c0_10, %c0_11] : memref<1x8x128xf32, #tpu.memory_space<vmem>>, vector<1x8x128xf32>
    %15 = vector.shape_cast %14 : vector<1x8x128xf32> to vector<8x128xf32>
    %16 = vector.shape_cast %13 : vector<8x128xf32> to vector<1x8x128xf32>
    tpu.vector_store %arg6[%c0_9, %c0_10, %c0_11], %16 {strides = array<i32>} : memref<1x8x128xf32, #tpu.memory_space<vmem>>, vector<1x8x128xf32>,
    return
  }
  func.func @transform_0(%arg0: i32, %arg1: i32) -> (i32, i32, i32) {
    %c0_i32 = arith.constant 0 : i32
    %c0_i32_0 = arith.constant 0 : i32
    return %arg0, %c0_i32, %arg1 : i32, i32, i32
  }
  func.func @transform_1(%arg0: i32, %arg1: i32) -> (i32, i32, i32) {
    %c0_i32 = arith.constant 0 : i32
    %c0_i32_0 = arith.constant 0 : i32
    return %arg0, %c0_i32, %arg1 : i32, i32, i32
  }
  func.func @transform_2(%arg0: i32, %arg1: i32) -> (i32, i32) {
    %c0_i32 = arith.constant 0 : i32
    %c0_i32_0 = arith.constant 0 : i32
    %c0_i32_1 = arith.constant 0 : i32
    return %c0_i32, %c0_i32_0 : i32, i32
  }
  func.func @transform_3(%arg0: i32, %arg1: i32) -> (i32, i32) {
    %c0_i32 = arith.constant 0 : i32
    %c0_i32_0 = arith.constant 0 : i32
    %c0_i32_1 = arith.constant 0 : i32
    return %c0_i32, %c0_i32_0 : i32, i32
  }
  func.func @transform_4(%arg0: i32, %arg1: i32) -> (i32, i32, i32) {
    %c0_i32 = arith.constant 0 : i32
    %c0_i32_0 = arith.constant 0 : i32
    return %arg0, %c0_i32, %arg1 : i32, i32, i32
  }
}

module attributes {stable_mosaic.version = 11 : i64} {
  func.func @_conv1_kernel(%arg0: i32, %arg1: i32, %arg2: memref<1x8x256xf32, #tpu.memory_space<vmem>>, %arg3: memref<8x72xbf16, #tpu.memory_space<vmem>>, %arg4: memref<1x8x128xbf16, #tpu.memory_space<vmem>>, %arg5: memref<1x1x8x1xf32, #tpu.memory_space<vmem>>, %arg6: memref<1x1x8x1xf32, #tpu.memory_space<vmem>>) attributes {dimension_semantics = [#tpu.dimension_semantics<parallel>, #tpu.dimension_semantics<parallel>], iteration_bounds = array<i64: 2, 2>, scalar_prefetch = 0 : i64, scratch_operands = 0 : i64, tpu.core_type = #tpu.core_type<tc>, window_params = [{transform_indices = @transform_0, window_bounds = array<i64: 1, 8, 256>}, {pipeline_mode = #tpu.pipeline_mode<synchronous>, transform_indices = @transform_1, window_bounds = array<i64: 8, 72>}, {transform_indices = @transform_2, window_bounds = array<i64: 1, 8, 128>}, {transform_indices = @transform_3, window_bounds = array<i64: 1, 1, 8, 1>}, {transform_indices = @transform_4, window_bounds = array<i64: 1, 1, 8, 1>}]} {
    %c128_i32 = arith.constant 128 : i32
    %0 = arith.muli %arg1, %c128_i32 : i32
    %1 = tpu.assume_multiple %0, 128 : i32
    %c0 = arith.constant 0 : index
    %c0_0 = arith.constant 0 : index
    %2 = arith.index_cast %1 : i32 to index
    %3 = vector.load %arg2[%c0, %c0_0, %2] : memref<1x8x256xf32, #tpu.memory_space<vmem>>, vector<1x8x128xf32>
    %4 = vector.shape_cast %3 : vector<1x8x128xf32> to vector<8x128xf32>
    %c128_i32_1 = arith.constant 128 : i32
    %5 = arith.muli %arg1, %c128_i32_1 : i32
    %c128_i32_2 = arith.constant 128 : i32
    %6 = arith.subi %5, %c128_i32_2 : i32
    %c0_i32 = arith.constant 0 : i32
    %7 = arith.maxsi %6, %c0_i32 : i32
    %8 = tpu.assume_multiple %7, 128 : i32
    %c0_3 = arith.constant 0 : index
    %c0_4 = arith.constant 0 : index
    %9 = arith.index_cast %8 : i32 to index
    %10 = vector.load %arg2[%c0_3, %c0_4, %9] : memref<1x8x256xf32, #tpu.memory_space<vmem>>, vector<1x8x128xf32>
    %11 = vector.shape_cast %10 : vector<1x8x128xf32> to vector<8x128xf32>
    %12 = vector.extract_strided_slice %11 {offsets = [0, 112], sizes = [8, 16], strides = [1, 1]} : vector<8x128xf32> to vector<8x16xf32>
    %c0_i32_5 = arith.constant 0 : i32
    %13 = arith.cmpi eq, %arg1, %c0_i32_5 : i32
    %cst = arith.constant 0.000000e+00 : f32
    %14 = vector.broadcast %cst : f32 to vector<8x16xf32>
    %15 = arith.select %13, %14, %12 : vector<8x16xf32>
    %c1_i32 = arith.constant 1 : i32
    %16 = arith.addi %arg1, %c1_i32 : i32
    %c128_i32_6 = arith.constant 128 : i32
    %17 = arith.muli %16, %c128_i32_6 : i32
    %c128_i32_7 = arith.constant 128 : i32
    %18 = arith.minsi %17, %c128_i32_7 : i32
    %19 = tpu.assume_multiple %18, 128 : i32
    %c0_8 = arith.constant 0 : index
    %c0_9 = arith.constant 0 : index
    %20 = arith.index_cast %19 : i32 to index
    %21 = vector.load %arg2[%c0_8, %c0_9, %20] : memref<1x8x256xf32, #tpu.memory_space<vmem>>, vector<1x8x128xf32>
    %22 = vector.shape_cast %21 : vector<1x8x128xf32> to vector<8x128xf32>
    %23 = vector.extract_strided_slice %22 {offsets = [0, 0], sizes = [8, 16], strides = [1, 1]} : vector<8x128xf32> to vector<8x16xf32>
    %c1_i32_10 = arith.constant 1 : i32
    %24 = arith.cmpi eq, %arg1, %c1_i32_10 : i32
    %cst_11 = arith.constant 0.000000e+00 : f32
    %25 = vector.broadcast %cst_11 : f32 to vector<8x16xf32>
    %26 = arith.select %24, %25, %23 : vector<8x16xf32>
    %27 = tpu.concatenate %15, %4, %26 in 1 : vector<8x16xf32>, vector<8x128xf32>, vector<8x16xf32> -> vector<8x160xf32>
    %cst_12 = arith.constant 0.000000e+00 : f32
    %28 = vector.broadcast %cst_12 : f32 to vector<8x128xf32>
    %29 = tpu.concatenate %28, %27, %28 in 1 : vector<8x128xf32>, vector<8x160xf32>, vector<8x128xf32> -> vector<8x416xf32>
    %30 = tpu.iota {dimensions = array<i32: 1>} : vector<1x128xi32>
    %c16_i32 = arith.constant 16 : i32
    %c0_i32_13 = arith.constant 0 : i32
    %31 = arith.cmpi eq, %c16_i32, %c0_i32_13 : i32
    %c1_i32_14 = arith.constant 1 : i32
    %32 = arith.select %31, %c1_i32_14, %c16_i32 : i32
    %33 = vector.broadcast %32 : i32 to vector<1x128xi32>
    %34 = arith.remsi %30, %33 : vector<1x128xi32>
    %c0_i32_15 = arith.constant 0 : i32
    %35 = vector.broadcast %c0_i32_15 : i32 to vector<1x128xi32>
    %36 = arith.cmpi ne, %34, %35 : vector<1x128xi32>
    %c0_i32_16 = arith.constant 0 : i32
    %37 = vector.broadcast %c0_i32_16 : i32 to vector<1x128xi32>
    %38 = arith.cmpi slt, %34, %37 : vector<1x128xi32>
    %c0_i32_17 = arith.constant 0 : i32
    %39 = arith.cmpi slt, %32, %c0_i32_17 : i32
    %40 = vector.broadcast %39 : i1 to vector<1x128xi1>
    %41 = vector.broadcast %40 : vector<1x128xi1> to vector<1x128xi1>
    %42 = arith.xori %38, %41 : vector<1x128xi1>
    %43 = arith.andi %42, %36 : vector<1x128xi1>
    %44 = vector.broadcast %32 : i32 to vector<1x128xi32>
    %45 = arith.addi %34, %44 : vector<1x128xi32>
    %46 = arith.select %43, %45, %34 : vector<1x128xi1>, vector<1x128xi32>
    %c1_i32_18 = arith.constant 1 : i32
    %47 = vector.broadcast %c1_i32_18 : i32 to vector<1x128xi32>
    %48 = arith.cmpi sge, %46, %47 : vector<1x128xi32>
    %c14_i32 = arith.constant 14 : i32
    %49 = vector.broadcast %c14_i32 : i32 to vector<1x128xi32>
    %50 = arith.cmpi sle, %46, %49 : vector<1x128xi32>
    %cst_19 = arith.constant 0.000000e+00 : f32
    %51 = vector.broadcast %cst_19 : f32 to vector<8x128xf32>
    %52 = vector.extract_strided_slice %29 {offsets = [0, 127], sizes = [8, 128], strides = [1, 1]} : vector<8x416xf32> to vector<8x128xf32>
    %cst_20 = arith.constant 0.000000e+00 : f32
    %53 = vector.shape_cast %48 : vector<1x128xi1> to vector<1x128xi1>
    %54 = vector.broadcast %53 : vector<1x128xi1> to vector<8x128xi1>
    %55 = vector.broadcast %cst_20 : f32 to vector<8x128xf32>
    %56 = arith.select %54, %52, %55 : vector<8x128xi1>, vector<8x128xf32>
    %57 = arith.truncf %56 : vector<8x128xf32> to vector<8x128xbf16>
    %58 = vector.extract_strided_slice %29 {offsets = [0, 128], sizes = [8, 128], strides = [1, 1]} : vector<8x416xf32> to vector<8x128xf32>
    %59 = arith.truncf %58 : vector<8x128xf32> to vector<8x128xbf16>
    %60 = vector.extract_strided_slice %29 {offsets = [0, 129], sizes = [8, 128], strides = [1, 1]} : vector<8x416xf32> to vector<8x128xf32>
    %cst_21 = arith.constant 0.000000e+00 : f32
    %61 = vector.shape_cast %50 : vector<1x128xi1> to vector<1x128xi1>
    %62 = vector.broadcast %61 : vector<1x128xi1> to vector<8x128xi1>
    %63 = vector.broadcast %cst_21 : f32 to vector<8x128xf32>
    %64 = arith.select %62, %60, %63 : vector<8x128xi1>, vector<8x128xf32>
    %65 = arith.truncf %64 : vector<8x128xf32> to vector<8x128xbf16>
    %66 = tpu.concatenate %57, %59, %65 in 0 : vector<8x128xbf16>, vector<8x128xbf16>, vector<8x128xbf16> -> vector<24x128xbf16>
    %c0_22 = arith.constant 0 : index
    %c0_23 = arith.constant 0 : index
    %67 = vector.load %arg3[%c0_22, %c0_23] : memref<8x72xbf16, #tpu.memory_space<vmem>>, vector<8x24xbf16>
    %cst_24 = arith.constant dense<0.000000e+00> : vector<8x128xf32>
    %68 = tpu.matmul %67, %66, %cst_24 {dimension_numbers = #tpu.dot_dimension_numbers<[1], [0], [0], [1], [0, 0, 1, 1], [], []>} : vector<8x24xbf16>, vector<24x128xbf16>, vector<8x128xf32> -> vector<8x128xf32>
    %69 = arith.addf %51, %68 : vector<8x128xf32>
    %70 = vector.extract_strided_slice %29 {offsets = [0, 143], sizes = [8, 128], strides = [1, 1]} : vector<8x416xf32> to vector<8x128xf32>
    %cst_25 = arith.constant 0.000000e+00 : f32
    %71 = vector.shape_cast %48 : vector<1x128xi1> to vector<1x128xi1>
    %72 = vector.broadcast %71 : vector<1x128xi1> to vector<8x128xi1>
    %73 = vector.broadcast %cst_25 : f32 to vector<8x128xf32>
    %74 = arith.select %72, %70, %73 : vector<8x128xi1>, vector<8x128xf32>
    %75 = arith.truncf %74 : vector<8x128xf32> to vector<8x128xbf16>
    %76 = vector.extract_strided_slice %29 {offsets = [0, 144], sizes = [8, 128], strides = [1, 1]} : vector<8x416xf32> to vector<8x128xf32>
    %77 = arith.truncf %76 : vector<8x128xf32> to vector<8x128xbf16>
    %78 = vector.extract_strided_slice %29 {offsets = [0, 145], sizes = [8, 128], strides = [1, 1]} : vector<8x416xf32> to vector<8x128xf32>
    %cst_26 = arith.constant 0.000000e+00 : f32
    %79 = vector.shape_cast %50 : vector<1x128xi1> to vector<1x128xi1>
    %80 = vector.broadcast %79 : vector<1x128xi1> to vector<8x128xi1>
    %81 = vector.broadcast %cst_26 : f32 to vector<8x128xf32>
    %82 = arith.select %80, %78, %81 : vector<8x128xi1>, vector<8x128xf32>
    %83 = arith.truncf %82 : vector<8x128xf32> to vector<8x128xbf16>
    %84 = tpu.concatenate %75, %77, %83 in 0 : vector<8x128xbf16>, vector<8x128xbf16>, vector<8x128xbf16> -> vector<24x128xbf16>
    %c0_27 = arith.constant 0 : index
    %c24 = arith.constant 24 : index
    %85 = vector.load %arg3[%c0_27, %c24] : memref<8x72xbf16, #tpu.memory_space<vmem>>, vector<8x24xbf16>
    %cst_28 = arith.constant dense<0.000000e+00> : vector<8x128xf32>
    %86 = tpu.matmul %85, %84, %cst_28 {dimension_numbers = #tpu.dot_dimension_numbers<[1], [0], [0], [1], [0, 0, 1, 1], [], []>} : vector<8x24xbf16>, vector<24x128xbf16>, vector<8x128xf32> -> vector<8x128xf32>
    %87 = arith.addf %69, %86 : vector<8x128xf32>
    %88 = vector.extract_strided_slice %29 {offsets = [0, 159], sizes = [8, 128], strides = [1, 1]} : vector<8x416xf32> to vector<8x128xf32>
    %cst_29 = arith.constant 0.000000e+00 : f32
    %89 = vector.shape_cast %48 : vector<1x128xi1> to vector<1x128xi1>
    %90 = vector.broadcast %89 : vector<1x128xi1> to vector<8x128xi1>
    %91 = vector.broadcast %cst_29 : f32 to vector<8x128xf32>
    %92 = arith.select %90, %88, %91 : vector<8x128xi1>, vector<8x128xf32>
    %93 = arith.truncf %92 : vector<8x128xf32> to vector<8x128xbf16>
    %94 = vector.extract_strided_slice %29 {offsets = [0, 160], sizes = [8, 128], strides = [1, 1]} : vector<8x416xf32> to vector<8x128xf32>
    %95 = arith.truncf %94 : vector<8x128xf32> to vector<8x128xbf16>
    %96 = vector.extract_strided_slice %29 {offsets = [0, 161], sizes = [8, 128], strides = [1, 1]} : vector<8x416xf32> to vector<8x128xf32>
    %cst_30 = arith.constant 0.000000e+00 : f32
    %97 = vector.shape_cast %50 : vector<1x128xi1> to vector<1x128xi1>
    %98 = vector.broadcast %97 : vector<1x128xi1> to vector<8x128xi1>
    %99 = vector.broadcast %cst_30 : f32 to vector<8x128xf32>
    %100 = arith.select %98, %96, %99 : vector<8x128xi1>, vector<8x128xf32>
    %101 = arith.truncf %100 : vector<8x128xf32> to vector<8x128xbf16>
    %102 = tpu.concatenate %93, %95, %101 in 0 : vector<8x128xbf16>, vector<8x128xbf16>, vector<8x128xbf16> -> vector<24x128xbf16>
    %c0_31 = arith.constant 0 : index
    %c48 = arith.constant 48 : index
    %103 = vector.load %arg3[%c0_31, %c48] : memref<8x72xbf16, #tpu.memory_space<vmem>>, vector<8x24xbf16>
    %cst_32 = arith.constant dense<0.000000e+00> : vector<8x128xf32>
    %104 = tpu.matmul %103, %102, %cst_32 {dimension_numbers = #tpu.dot_dimension_numbers<[1], [0], [0], [1], [0, 0, 1, 1], [], []>} : vector<8x24xbf16>, vector<24x128xbf16>, vector<8x128xf32> -> vector<8x128xf32>
    %105 = arith.addf %87, %104 : vector<8x128xf32>
    %cst_33 = arith.constant dense<0.000000e+00> : vector<8xf32>
    %106 = vector.multi_reduction <add>, %105, %cst_33 [1] : vector<8x128xf32> to vector<8xf32>
    %107 = vector.shape_cast %106 : vector<8xf32> to vector<8x1xf32>
    %c0_34 = arith.constant 0 : index
    %c0_35 = arith.constant 0 : index
    %c0_36 = arith.constant 0 : index
    %c0_37 = arith.constant 0 : index
    %108 = vector.load %arg5[%c0_34, %c0_35, %c0_36, %c0_37] : memref<1x1x8x1xf32, #tpu.memory_space<vmem>>, vector<1x1x8x1xf32>
    %109 = vector.shape_cast %108 : vector<1x1x8x1xf32> to vector<8x1xf32>
    %110 = vector.shape_cast %107 : vector<8x1xf32> to vector<1x1x8x1xf32>
    tpu.vector_store %arg5[%c0_34, %c0_35, %c0_36, %c0_37], %110 {strides = array<i32>} : memref<1x1x8x1xf32, #tpu.memory_space<vmem>>, vector<1x1x8x1xf32>,
    %111 = arith.mulf %105, %105 : vector<8x128xf32>
    %cst_38 = arith.constant dense<0.000000e+00> : vector<8xf32>
    %112 = vector.multi_reduction <add>, %111, %cst_38 [1] : vector<8x128xf32> to vector<8xf32>
    %113 = vector.shape_cast %112 : vector<8xf32> to vector<8x1xf32>
    %c0_39 = arith.constant 0 : index
    %c0_40 = arith.constant 0 : index
    %c0_41 = arith.constant 0 : index
    %c0_42 = arith.constant 0 : index
    %114 = vector.load %arg6[%c0_39, %c0_40, %c0_41, %c0_42] : memref<1x1x8x1xf32, #tpu.memory_space<vmem>>, vector<1x1x8x1xf32>
    %115 = vector.shape_cast %114 : vector<1x1x8x1xf32> to vector<8x1xf32>
    %116 = vector.shape_cast %113 : vector<8x1xf32> to vector<1x1x8x1xf32>
    tpu.vector_store %arg6[%c0_39, %c0_40, %c0_41, %c0_42], %116 {strides = array<i32>} : memref<1x1x8x1xf32, #tpu.memory_space<vmem>>, vector<1x1x8x1xf32>,
    %117 = arith.truncf %105 : vector<8x128xf32> to vector<8x128xbf16>
    %c0_43 = arith.constant 0 : index
    %c0_44 = arith.constant 0 : index
    %c0_45 = arith.constant 0 : index
    %118 = vector.load %arg4[%c0_43, %c0_44, %c0_45] : memref<1x8x128xbf16, #tpu.memory_space<vmem>>, vector<1x8x128xbf16>
    %119 = vector.shape_cast %118 : vector<1x8x128xbf16> to vector<8x128xbf16>
    %120 = vector.shape_cast %117 : vector<8x128xbf16> to vector<1x8x128xbf16>
    tpu.vector_store %arg4[%c0_43, %c0_44, %c0_45], %120 {strides = array<i32>} : memref<1x8x128xbf16, #tpu.memory_space<vmem>>, vector<1x8x128xbf16>,
    return
  }
  func.func @transform_0(%arg0: i32, %arg1: i32) -> (i32, i32, i32) {
    %c0_i32 = arith.constant 0 : i32
    %c0_i32_0 = arith.constant 0 : i32
    %c0_i32_1 = arith.constant 0 : i32
    return %arg0, %c0_i32, %c0_i32_0 : i32, i32, i32
  }
  func.func @transform_1(%arg0: i32, %arg1: i32) -> (i32, i32) {
    %c0_i32 = arith.constant 0 : i32
    %c0_i32_0 = arith.constant 0 : i32
    %c0_i32_1 = arith.constant 0 : i32
    return %c0_i32, %c0_i32_0 : i32, i32
  }
  func.func @transform_2(%arg0: i32, %arg1: i32) -> (i32, i32, i32) {
    %c0_i32 = arith.constant 0 : i32
    %c0_i32_0 = arith.constant 0 : i32
    return %arg0, %c0_i32, %arg1 : i32, i32, i32
  }
  func.func @transform_3(%arg0: i32, %arg1: i32) -> (i32, i32, i32, i32) {
    %c0_i32 = arith.constant 0 : i32
    %c0_i32_0 = arith.constant 0 : i32
    %c0_i32_1 = arith.constant 0 : i32
    return %arg0, %arg1, %c0_i32, %c0_i32_0 : i32, i32, i32, i32
  }
  func.func @transform_4(%arg0: i32, %arg1: i32) -> (i32, i32, i32, i32) {
    %c0_i32 = arith.constant 0 : i32
    %c0_i32_0 = arith.constant 0 : i32
    %c0_i32_1 = arith.constant 0 : i32
    return %arg0, %arg1, %c0_i32, %c0_i32_0 : i32, i32, i32, i32
  }
}

module attributes {stable_mosaic.version = 11 : i64} {
  func.func @_conv2_kernel(%arg0: i32, %arg1: i32, %arg2: memref<1x8x256xbf16, #tpu.memory_space<vmem>>, %arg3: memref<8x72xbf16, #tpu.memory_space<vmem>>, %arg4: memref<8x1xf32, #tpu.memory_space<vmem>>, %arg5: memref<8x1xf32, #tpu.memory_space<vmem>>, %arg6: memref<1x8x128xbf16, #tpu.memory_space<vmem>>, %arg7: memref<1x1x8x1xf32, #tpu.memory_space<vmem>>, %arg8: memref<1x1x8x1xf32, #tpu.memory_space<vmem>>) attributes {dimension_semantics = [#tpu.dimension_semantics<parallel>, #tpu.dimension_semantics<parallel>], iteration_bounds = array<i64: 2, 2>, scalar_prefetch = 0 : i64, scratch_operands = 0 : i64, tpu.core_type = #tpu.core_type<tc>, window_params = [{transform_indices = @transform_0, window_bounds = array<i64: 1, 8, 256>}, {pipeline_mode = #tpu.pipeline_mode<synchronous>, transform_indices = @transform_1, window_bounds = array<i64: 8, 72>}, {pipeline_mode = #tpu.pipeline_mode<synchronous>, transform_indices = @transform_2, window_bounds = array<i64: 8, 1>}, {pipeline_mode = #tpu.pipeline_mode<synchronous>, transform_indices = @transform_3, window_bounds = array<i64: 8, 1>}, {transform_indices = @transform_4, window_bounds = array<i64: 1, 8, 128>}, {transform_indices = @transform_5, window_bounds = array<i64: 1, 1, 8, 1>}, {transform_indices = @transform_6, window_bounds = array<i64: 1, 1, 8, 1>}]} {
    %c0 = arith.constant 0 : index
    %c0_0 = arith.constant 0 : index
    %0 = vector.load %arg4[%c0, %c0_0] : memref<8x1xf32, #tpu.memory_space<vmem>>, vector<8x1xf32>
    %c0_1 = arith.constant 0 : index
    %c0_2 = arith.constant 0 : index
    %1 = vector.load %arg5[%c0_1, %c0_2] : memref<8x1xf32, #tpu.memory_space<vmem>>, vector<8x1xf32>
    %c128_i32 = arith.constant 128 : i32
    %2 = arith.muli %arg1, %c128_i32 : i32
    %3 = tpu.assume_multiple %2, 128 : i32
    %c0_3 = arith.constant 0 : index
    %c0_4 = arith.constant 0 : index
    %4 = arith.index_cast %3 : i32 to index
    %5 = vector.load %arg2[%c0_3, %c0_4, %4] : memref<1x8x256xbf16, #tpu.memory_space<vmem>>, vector<1x8x128xbf16>
    %6 = vector.shape_cast %5 : vector<1x8x128xbf16> to vector<8x128xbf16>
    %7 = arith.extf %6 : vector<8x128xbf16> to vector<8x128xf32>
    %8 = vector.broadcast %0 : vector<8x1xf32> to vector<8x128xf32>
    %9 = arith.mulf %7, %8 : vector<8x128xf32>
    %10 = vector.broadcast %1 : vector<8x1xf32> to vector<8x128xf32>
    %11 = arith.addf %9, %10 : vector<8x128xf32>
    %cst = arith.constant 0.000000e+00 : f32
    %12 = vector.broadcast %cst : f32 to vector<8x128xf32>
    %13 = arith.maximumf %11, %12 : vector<8x128xf32>
    %c128_i32_5 = arith.constant 128 : i32
    %14 = arith.muli %arg1, %c128_i32_5 : i32
    %c128_i32_6 = arith.constant 128 : i32
    %15 = arith.subi %14, %c128_i32_6 : i32
    %c0_i32 = arith.constant 0 : i32
    %16 = arith.maxsi %15, %c0_i32 : i32
    %17 = tpu.assume_multiple %16, 128 : i32
    %c0_7 = arith.constant 0 : index
    %c0_8 = arith.constant 0 : index
    %18 = arith.index_cast %17 : i32 to index
    %19 = vector.load %arg2[%c0_7, %c0_8, %18] : memref<1x8x256xbf16, #tpu.memory_space<vmem>>, vector<1x8x128xbf16>
    %20 = vector.shape_cast %19 : vector<1x8x128xbf16> to vector<8x128xbf16>
    %21 = arith.extf %20 : vector<8x128xbf16> to vector<8x128xf32>
    %22 = vector.broadcast %0 : vector<8x1xf32> to vector<8x128xf32>
    %23 = arith.mulf %21, %22 : vector<8x128xf32>
    %24 = vector.broadcast %1 : vector<8x1xf32> to vector<8x128xf32>
    %25 = arith.addf %23, %24 : vector<8x128xf32>
    %cst_9 = arith.constant 0.000000e+00 : f32
    %26 = vector.broadcast %cst_9 : f32 to vector<8x128xf32>
    %27 = arith.maximumf %25, %26 : vector<8x128xf32>
    %28 = vector.extract_strided_slice %27 {offsets = [0, 112], sizes = [8, 16], strides = [1, 1]} : vector<8x128xf32> to vector<8x16xf32>
    %c0_i32_10 = arith.constant 0 : i32
    %29 = arith.cmpi eq, %arg1, %c0_i32_10 : i32
    %cst_11 = arith.constant 0.000000e+00 : f32
    %30 = vector.broadcast %cst_11 : f32 to vector<8x16xf32>
    %31 = arith.select %29, %30, %28 : vector<8x16xf32>
    %c1_i32 = arith.constant 1 : i32
    %32 = arith.addi %arg1, %c1_i32 : i32
    %c128_i32_12 = arith.constant 128 : i32
    %33 = arith.muli %32, %c128_i32_12 : i32
    %c128_i32_13 = arith.constant 128 : i32
    %34 = arith.minsi %33, %c128_i32_13 : i32
    %35 = tpu.assume_multiple %34, 128 : i32
    %c0_14 = arith.constant 0 : index
    %c0_15 = arith.constant 0 : index
    %36 = arith.index_cast %35 : i32 to index
    %37 = vector.load %arg2[%c0_14, %c0_15, %36] : memref<1x8x256xbf16, #tpu.memory_space<vmem>>, vector<1x8x128xbf16>
    %38 = vector.shape_cast %37 : vector<1x8x128xbf16> to vector<8x128xbf16>
    %39 = arith.extf %38 : vector<8x128xbf16> to vector<8x128xf32>
    %40 = vector.broadcast %0 : vector<8x1xf32> to vector<8x128xf32>
    %41 = arith.mulf %39, %40 : vector<8x128xf32>
    %42 = vector.broadcast %1 : vector<8x1xf32> to vector<8x128xf32>
    %43 = arith.addf %41, %42 : vector<8x128xf32>
    %cst_16 = arith.constant 0.000000e+00 : f32
    %44 = vector.broadcast %cst_16 : f32 to vector<8x128xf32>
    %45 = arith.maximumf %43, %44 : vector<8x128xf32>
    %46 = vector.extract_strided_slice %45 {offsets = [0, 0], sizes = [8, 16], strides = [1, 1]} : vector<8x128xf32> to vector<8x16xf32>
    %c1_i32_17 = arith.constant 1 : i32
    %47 = arith.cmpi eq, %arg1, %c1_i32_17 : i32
    %cst_18 = arith.constant 0.000000e+00 : f32
    %48 = vector.broadcast %cst_18 : f32 to vector<8x16xf32>
    %49 = arith.select %47, %48, %46 : vector<8x16xf32>
    %50 = tpu.concatenate %31, %13, %49 in 1 : vector<8x16xf32>, vector<8x128xf32>, vector<8x16xf32> -> vector<8x160xf32>
    %cst_19 = arith.constant 0.000000e+00 : f32
    %51 = vector.broadcast %cst_19 : f32 to vector<8x128xf32>
    %52 = tpu.concatenate %51, %50, %51 in 1 : vector<8x128xf32>, vector<8x160xf32>, vector<8x128xf32> -> vector<8x416xf32>
    %53 = tpu.iota {dimensions = array<i32: 1>} : vector<1x128xi32>
    %c16_i32 = arith.constant 16 : i32
    %c0_i32_20 = arith.constant 0 : i32
    %54 = arith.cmpi eq, %c16_i32, %c0_i32_20 : i32
    %c1_i32_21 = arith.constant 1 : i32
    %55 = arith.select %54, %c1_i32_21, %c16_i32 : i32
    %56 = vector.broadcast %55 : i32 to vector<1x128xi32>
    %57 = arith.remsi %53, %56 : vector<1x128xi32>
    %c0_i32_22 = arith.constant 0 : i32
    %58 = vector.broadcast %c0_i32_22 : i32 to vector<1x128xi32>
    %59 = arith.cmpi ne, %57, %58 : vector<1x128xi32>
    %c0_i32_23 = arith.constant 0 : i32
    %60 = vector.broadcast %c0_i32_23 : i32 to vector<1x128xi32>
    %61 = arith.cmpi slt, %57, %60 : vector<1x128xi32>
    %c0_i32_24 = arith.constant 0 : i32
    %62 = arith.cmpi slt, %55, %c0_i32_24 : i32
    %63 = vector.broadcast %62 : i1 to vector<1x128xi1>
    %64 = vector.broadcast %63 : vector<1x128xi1> to vector<1x128xi1>
    %65 = arith.xori %61, %64 : vector<1x128xi1>
    %66 = arith.andi %65, %59 : vector<1x128xi1>
    %67 = vector.broadcast %55 : i32 to vector<1x128xi32>
    %68 = arith.addi %57, %67 : vector<1x128xi32>
    %69 = arith.select %66, %68, %57 : vector<1x128xi1>, vector<1x128xi32>
    %c1_i32_25 = arith.constant 1 : i32
    %70 = vector.broadcast %c1_i32_25 : i32 to vector<1x128xi32>
    %71 = arith.cmpi sge, %69, %70 : vector<1x128xi32>
    %c14_i32 = arith.constant 14 : i32
    %72 = vector.broadcast %c14_i32 : i32 to vector<1x128xi32>
    %73 = arith.cmpi sle, %69, %72 : vector<1x128xi32>
    %cst_26 = arith.constant 0.000000e+00 : f32
    %74 = vector.broadcast %cst_26 : f32 to vector<8x128xf32>
    %75 = vector.extract_strided_slice %52 {offsets = [0, 127], sizes = [8, 128], strides = [1, 1]} : vector<8x416xf32> to vector<8x128xf32>
    %cst_27 = arith.constant 0.000000e+00 : f32
    %76 = vector.shape_cast %71 : vector<1x128xi1> to vector<1x128xi1>
    %77 = vector.broadcast %76 : vector<1x128xi1> to vector<8x128xi1>
    %78 = vector.broadcast %cst_27 : f32 to vector<8x128xf32>
    %79 = arith.select %77, %75, %78 : vector<8x128xi1>, vector<8x128xf32>
    %80 = arith.truncf %79 : vector<8x128xf32> to vector<8x128xbf16>
    %81 = vector.extract_strided_slice %52 {offsets = [0, 128], sizes = [8, 128], strides = [1, 1]} : vector<8x416xf32> to vector<8x128xf32>
    %82 = arith.truncf %81 : vector<8x128xf32> to vector<8x128xbf16>
    %83 = vector.extract_strided_slice %52 {offsets = [0, 129], sizes = [8, 128], strides = [1, 1]} : vector<8x416xf32> to vector<8x128xf32>
    %cst_28 = arith.constant 0.000000e+00 : f32
    %84 = vector.shape_cast %73 : vector<1x128xi1> to vector<1x128xi1>
    %85 = vector.broadcast %84 : vector<1x128xi1> to vector<8x128xi1>
    %86 = vector.broadcast %cst_28 : f32 to vector<8x128xf32>
    %87 = arith.select %85, %83, %86 : vector<8x128xi1>, vector<8x128xf32>
    %88 = arith.truncf %87 : vector<8x128xf32> to vector<8x128xbf16>
    %89 = tpu.concatenate %80, %82, %88 in 0 : vector<8x128xbf16>, vector<8x128xbf16>, vector<8x128xbf16> -> vector<24x128xbf16>
    %c0_29 = arith.constant 0 : index
    %c0_30 = arith.constant 0 : index
    %90 = vector.load %arg3[%c0_29, %c0_30] : memref<8x72xbf16, #tpu.memory_space<vmem>>, vector<8x24xbf16>
    %cst_31 = arith.constant dense<0.000000e+00> : vector<8x128xf32>
    %91 = tpu.matmul %90, %89, %cst_31 {dimension_numbers = #tpu.dot_dimension_numbers<[1], [0], [0], [1], [0, 0, 1, 1], [], []>} : vector<8x24xbf16>, vector<24x128xbf16>, vector<8x128xf32> -> vector<8x128xf32>
    %92 = arith.addf %74, %91 : vector<8x128xf32>
    %93 = vector.extract_strided_slice %52 {offsets = [0, 143], sizes = [8, 128], strides = [1, 1]} : vector<8x416xf32> to vector<8x128xf32>
    %cst_32 = arith.constant 0.000000e+00 : f32
    %94 = vector.shape_cast %71 : vector<1x128xi1> to vector<1x128xi1>
    %95 = vector.broadcast %94 : vector<1x128xi1> to vector<8x128xi1>
    %96 = vector.broadcast %cst_32 : f32 to vector<8x128xf32>
    %97 = arith.select %95, %93, %96 : vector<8x128xi1>, vector<8x128xf32>
    %98 = arith.truncf %97 : vector<8x128xf32> to vector<8x128xbf16>
    %99 = vector.extract_strided_slice %52 {offsets = [0, 144], sizes = [8, 128], strides = [1, 1]} : vector<8x416xf32> to vector<8x128xf32>
    %100 = arith.truncf %99 : vector<8x128xf32> to vector<8x128xbf16>
    %101 = vector.extract_strided_slice %52 {offsets = [0, 145], sizes = [8, 128], strides = [1, 1]} : vector<8x416xf32> to vector<8x128xf32>
    %cst_33 = arith.constant 0.000000e+00 : f32
    %102 = vector.shape_cast %73 : vector<1x128xi1> to vector<1x128xi1>
    %103 = vector.broadcast %102 : vector<1x128xi1> to vector<8x128xi1>
    %104 = vector.broadcast %cst_33 : f32 to vector<8x128xf32>
    %105 = arith.select %103, %101, %104 : vector<8x128xi1>, vector<8x128xf32>
    %106 = arith.truncf %105 : vector<8x128xf32> to vector<8x128xbf16>
    %107 = tpu.concatenate %98, %100, %106 in 0 : vector<8x128xbf16>, vector<8x128xbf16>, vector<8x128xbf16> -> vector<24x128xbf16>
    %c0_34 = arith.constant 0 : index
    %c24 = arith.constant 24 : index
    %108 = vector.load %arg3[%c0_34, %c24] : memref<8x72xbf16, #tpu.memory_space<vmem>>, vector<8x24xbf16>
    %cst_35 = arith.constant dense<0.000000e+00> : vector<8x128xf32>
    %109 = tpu.matmul %108, %107, %cst_35 {dimension_numbers = #tpu.dot_dimension_numbers<[1], [0], [0], [1], [0, 0, 1, 1], [], []>} : vector<8x24xbf16>, vector<24x128xbf16>, vector<8x128xf32> -> vector<8x128xf32>
    %110 = arith.addf %92, %109 : vector<8x128xf32>
    %111 = vector.extract_strided_slice %52 {offsets = [0, 159], sizes = [8, 128], strides = [1, 1]} : vector<8x416xf32> to vector<8x128xf32>
    %cst_36 = arith.constant 0.000000e+00 : f32
    %112 = vector.shape_cast %71 : vector<1x128xi1> to vector<1x128xi1>
    %113 = vector.broadcast %112 : vector<1x128xi1> to vector<8x128xi1>
    %114 = vector.broadcast %cst_36 : f32 to vector<8x128xf32>
    %115 = arith.select %113, %111, %114 : vector<8x128xi1>, vector<8x128xf32>
    %116 = arith.truncf %115 : vector<8x128xf32> to vector<8x128xbf16>
    %117 = vector.extract_strided_slice %52 {offsets = [0, 160], sizes = [8, 128], strides = [1, 1]} : vector<8x416xf32> to vector<8x128xf32>
    %118 = arith.truncf %117 : vector<8x128xf32> to vector<8x128xbf16>
    %119 = vector.extract_strided_slice %52 {offsets = [0, 161], sizes = [8, 128], strides = [1, 1]} : vector<8x416xf32> to vector<8x128xf32>
    %cst_37 = arith.constant 0.000000e+00 : f32
    %120 = vector.shape_cast %73 : vector<1x128xi1> to vector<1x128xi1>
    %121 = vector.broadcast %120 : vector<1x128xi1> to vector<8x128xi1>
    %122 = vector.broadcast %cst_37 : f32 to vector<8x128xf32>
    %123 = arith.select %121, %119, %122 : vector<8x128xi1>, vector<8x128xf32>
    %124 = arith.truncf %123 : vector<8x128xf32> to vector<8x128xbf16>
    %125 = tpu.concatenate %116, %118, %124 in 0 : vector<8x128xbf16>, vector<8x128xbf16>, vector<8x128xbf16> -> vector<24x128xbf16>
    %c0_38 = arith.constant 0 : index
    %c48 = arith.constant 48 : index
    %126 = vector.load %arg3[%c0_38, %c48] : memref<8x72xbf16, #tpu.memory_space<vmem>>, vector<8x24xbf16>
    %cst_39 = arith.constant dense<0.000000e+00> : vector<8x128xf32>
    %127 = tpu.matmul %126, %125, %cst_39 {dimension_numbers = #tpu.dot_dimension_numbers<[1], [0], [0], [1], [0, 0, 1, 1], [], []>} : vector<8x24xbf16>, vector<24x128xbf16>, vector<8x128xf32> -> vector<8x128xf32>
    %128 = arith.addf %110, %127 : vector<8x128xf32>
    %cst_40 = arith.constant dense<0.000000e+00> : vector<8xf32>
    %129 = vector.multi_reduction <add>, %128, %cst_40 [1] : vector<8x128xf32> to vector<8xf32>
    %130 = vector.shape_cast %129 : vector<8xf32> to vector<8x1xf32>
    %c0_41 = arith.constant 0 : index
    %c0_42 = arith.constant 0 : index
    %c0_43 = arith.constant 0 : index
    %c0_44 = arith.constant 0 : index
    %131 = vector.load %arg7[%c0_41, %c0_42, %c0_43, %c0_44] : memref<1x1x8x1xf32, #tpu.memory_space<vmem>>, vector<1x1x8x1xf32>
    %132 = vector.shape_cast %131 : vector<1x1x8x1xf32> to vector<8x1xf32>
    %133 = vector.shape_cast %130 : vector<8x1xf32> to vector<1x1x8x1xf32>
    tpu.vector_store %arg7[%c0_41, %c0_42, %c0_43, %c0_44], %133 {strides = array<i32>} : memref<1x1x8x1xf32, #tpu.memory_space<vmem>>, vector<1x1x8x1xf32>,
    %134 = arith.mulf %128, %128 : vector<8x128xf32>
    %cst_45 = arith.constant dense<0.000000e+00> : vector<8xf32>
    %135 = vector.multi_reduction <add>, %134, %cst_45 [1] : vector<8x128xf32> to vector<8xf32>
    %136 = vector.shape_cast %135 : vector<8xf32> to vector<8x1xf32>
    %c0_46 = arith.constant 0 : index
    %c0_47 = arith.constant 0 : index
    %c0_48 = arith.constant 0 : index
    %c0_49 = arith.constant 0 : index
    %137 = vector.load %arg8[%c0_46, %c0_47, %c0_48, %c0_49] : memref<1x1x8x1xf32, #tpu.memory_space<vmem>>, vector<1x1x8x1xf32>
    %138 = vector.shape_cast %137 : vector<1x1x8x1xf32> to vector<8x1xf32>
    %139 = vector.shape_cast %136 : vector<8x1xf32> to vector<1x1x8x1xf32>
    tpu.vector_store %arg8[%c0_46, %c0_47, %c0_48, %c0_49], %139 {strides = array<i32>} : memref<1x1x8x1xf32, #tpu.memory_space<vmem>>, vector<1x1x8x1xf32>,
    %140 = arith.truncf %128 : vector<8x128xf32> to vector<8x128xbf16>
    %c0_50 = arith.constant 0 : index
    %c0_51 = arith.constant 0 : index
    %c0_52 = arith.constant 0 : index
    %141 = vector.load %arg6[%c0_50, %c0_51, %c0_52] : memref<1x8x128xbf16, #tpu.memory_space<vmem>>, vector<1x8x128xbf16>
    %142 = vector.shape_cast %141 : vector<1x8x128xbf16> to vector<8x128xbf16>
    %143 = vector.shape_cast %140 : vector<8x128xbf16> to vector<1x8x128xbf16>
    tpu.vector_store %arg6[%c0_50, %c0_51, %c0_52], %143 {strides = array<i32>} : memref<1x8x128xbf16, #tpu.memory_space<vmem>>, vector<1x8x128xbf16>,
    return
  }
  func.func @transform_0(%arg0: i32, %arg1: i32) -> (i32, i32, i32) {
    %c0_i32 = arith.constant 0 : i32
    %c0_i32_0 = arith.constant 0 : i32
    %c0_i32_1 = arith.constant 0 : i32
    return %arg0, %c0_i32, %c0_i32_0 : i32, i32, i32
  }
  func.func @transform_1(%arg0: i32, %arg1: i32) -> (i32, i32) {
    %c0_i32 = arith.constant 0 : i32
    %c0_i32_0 = arith.constant 0 : i32
    %c0_i32_1 = arith.constant 0 : i32
    return %c0_i32, %c0_i32_0 : i32, i32
  }
  func.func @transform_2(%arg0: i32, %arg1: i32) -> (i32, i32) {
    %c0_i32 = arith.constant 0 : i32
    %c0_i32_0 = arith.constant 0 : i32
    %c0_i32_1 = arith.constant 0 : i32
    return %c0_i32, %c0_i32_0 : i32, i32
  }
  func.func @transform_3(%arg0: i32, %arg1: i32) -> (i32, i32) {
    %c0_i32 = arith.constant 0 : i32
    %c0_i32_0 = arith.constant 0 : i32
    %c0_i32_1 = arith.constant 0 : i32
    return %c0_i32, %c0_i32_0 : i32, i32
  }
  func.func @transform_4(%arg0: i32, %arg1: i32) -> (i32, i32, i32) {
    %c0_i32 = arith.constant 0 : i32
    %c0_i32_0 = arith.constant 0 : i32
    return %arg0, %c0_i32, %arg1 : i32, i32, i32
  }
  func.func @transform_5(%arg0: i32, %arg1: i32) -> (i32, i32, i32, i32) {
    %c0_i32 = arith.constant 0 : i32
    %c0_i32_0 = arith.constant 0 : i32
    %c0_i32_1 = arith.constant 0 : i32
    return %arg0, %arg1, %c0_i32, %c0_i32_0 : i32, i32, i32, i32
  }
  func.func @transform_6(%arg0: i32, %arg1: i32) -> (i32, i32, i32, i32) {
    %c0_i32 = arith.constant 0 : i32
    %c0_i32_0 = arith.constant 0 : i32
    %c0_i32_1 = arith.constant 0 : i32
    return %arg0, %arg1, %c0_i32, %c0_i32_0 : i32, i32, i32, i32
  }
}

</mosaic_0001>

<bundles_post_ra>
// kernel: residual_block_forward.5
= control target key start
LH: loop header
LB: loop body
LE: loop exit
PB: predicated region body
PF: predicated region fallthrough
CT: control target
= control target key end

     0   :  { %s505_s15 = smov 0   ;;  %s507_s16 = smov 0   ;;  %s565_s0 = inlined_call_operand.vmem [shape: bf16[2,8,256], index: 0, kind: input, shape index: {}]   ;;  %s566_s1 = inlined_call_operand.vmem [shape: f32[2,8,256], index: 1, kind: input, shape index: {}]   ;;  %s567_s2 = inlined_call_operand.vmem [shape: f32[8,1], index: 2, kind: input, shape index: {}]   ;;  %s568_s3 = inlined_call_operand.vmem [shape: f32[8,1], index: 3, kind: input, shape index: {}]   ;;  %s569_s4 = inlined_call_operand.vmem [shape: f32[2,8,256], index: 4, kind: output, shape index: {}]  }
   0x1   :  { %s509_s17 = smov 0   ;;  %s511_s18 = smov 0  }
   0x2   :  { %s513_s19 = smov 0  }
   0x3 LB: > { %s23_s20 = sadd.s32 1, %s469_s17  ;;  %s26_s21 = sadd.s32 1, %s473_s18  ;;  %s477_s19 = sphi %s513_s19, %s14_s19   ;;  %s473_s18 = sphi %s511_s18, %s573_s18   ;;  %s469_s17 = sphi %s509_s17, %s572_s17   ;;  %s465_s16 = sphi %s507_s16, %s571_s16   ;;  %s461_s15 = sphi %s505_s15, %s570_s15  }
   0x4   : > { %p24_p0 = scmp.ge.s32.totalorder %s23_s20, 2  ;;  %p388_p1 = scmp.ge.s32.totalorder %s477_s19, 1 }
   0x5   : > { %p196_p2 = scmp.lt.s32.totalorder %s477_s19, 5 }
   0x6   : > { %s575_s20 = smov (%p24_p0, %s23_s20), 0  ;;  %s577_s21 = smov (!%p24_p0, %s26_s21), %s473_s18 }
   0x7   : > { %p197_p3 = pnand %p388_p1, %p196_p2  ;;  %p28_p4 = scmp.ge.s32.totalorder %s577_s21, 2 }
   0x8   : > { %p236_p5 = scmp.lt.s32.totalorder (!%p197_p3), %s465_s16, 1  ;;  %p238_p6 = scmp.lt.s32.totalorder (!%p197_p3), %s461_s15, 1 }
   0x9   : > { %s579_s21 = smov (%p28_p4, %s577_s21), 0  ;;  %200 = sbr.rel (%p197_p3) target bundleno = 146 (0x92), region = 36 }
   0xe   : > { %v262_v0 = vld [vmem:[%s567_s2] sm:$0xff]  ;;  %v479_v1 = vmov 0   ;;  %s581_s16 = smov (!%p236_p5, %s465_s16), 1  ;;  %s583_s15 = smov (!%p238_p6, %s461_s15), 1 }
   0xf   : > { %438 = vset.pattern.permute.xlu0 %v479_v1  ;;  %v269_v2 = vld [vmem:[%s568_s3] sm:$0xff]  ;;  %s389_s26 = sshll.u32 %s581_s16, 1 }
  0x10   : > { %265 = vperm.xlu0 %438, %v262_v0   ;;  %s241_s27 = sadd.s32 %s389_s26, %s583_s15 }
  0x11   : > { %s390_s28 = sshll.u32 %s241_s27, 2  ;;  %s392_s6 = sshll.u32 %s241_s27, 3 }
  0x12   : > { %s243_s5 = scalar_lea.vmem %s565_s0, %s390_s28  ;;  %s251_s9 = scalar_lea.vmem %s566_s1, %s392_s6 }
  0x13   : > { %v260_v4 = vld [vmem:[%s243_s5] sm:$0xf]  ;;  %s259_s12 = scalar_lea.vmem %s569_s4, %s392_s6 }
  0x14   : > { %v261_v5 = vunpack.c.l.bf16 %v260_v4  ;;  %v277_v9 = vld [vmem:[%s251_s9] sm:$0xff] }
  0x18   : > { %272 = vperm.xlu0 %438, %v269_v2  }
  0x82   : > { %v266_v3 = vpop.permute.xlu0 %265 }
  0x83   : > { %v268_v6 = vmul.f32 %v266_v3, %v261_v5 }
  0x8a   : > { %v273_v7 = vpop.permute.xlu0 %272 }
  0x8b   : > { %v275_v8 = vadd.f32 %v273_v7, %v268_v6 }
  0x8d   : > { %v276_v10 = vmax.f32 %v275_v8, 0.0 }
  0x8f   : > { %v278_v11 = vadd.f32 %v277_v9, %v276_v10 }
  0x91   : > { %279 = vst [vmem:[%s259_s12] sm:$0xff] %v278_v11 }
  0x92 PF: > { %s14_s19 = sadd.s32 1, %s477_s19   ;;  %s570_s15 = smov %s469_s17 }
  0x93   : > { %p11_p7 = scmp.ge.s32.totalorder %s14_s19, 6   ;;  %s571_s16 = smov %s473_s18 }
  0x94   : > { %s572_s17 = smov %s575_s20  ;;  %s573_s18 = smov %s579_s21 }
  0x95   :  { %13 = sbr.rel (!%p11_p7) target bundleno = 3 (0x3), region = 69 }

// kernel: residual_block_forward.3
= control target key start
LH: loop header
LB: loop body
LE: loop exit
PB: predicated region body
PF: predicated region fallthrough
CT: control target
= control target key end

     0   :  { %s875_s15 = smov 0   ;;  %s877_s16 = smov 0   ;;  %s986_s0 = inlined_call_operand.vmem [shape: f32[2,8,256], index: 0, kind: input, shape index: {}]   ;;  %s987_s1 = inlined_call_operand.vmem [shape: bf16[8,72], index: 1, kind: input, shape index: {}]   ;;  %s988_s2 = inlined_call_operand.vmem [shape: bf16[2,8,256], index: 2, kind: output, shape index: {0}]   ;;  %s989_s3 = inlined_call_operand.vmem [shape: f32[2,2,8,1], index: 3, kind: output, shape index: {1}]   ;;  %s990_s4 = inlined_call_operand.vmem [shape: f32[2,2,8,1], index: 4, kind: output, shape index: {2}]  }
   0x1   :  { %s879_s17 = smov 0   ;;  %s881_s18 = smov 0  }
   0x2   :  { %s883_s19 = smov 0  }
   0x3 LB: > { %s24_s20 = sadd.s32 1, %s828_s17  ;;  %s27_s21 = sadd.s32 1, %s832_s18  ;;  %s836_s19 = sphi %s883_s19, %s15_s19   ;;  %s832_s18 = sphi %s881_s18, %s998_s18   ;;  %s828_s17 = sphi %s879_s17, %s997_s17   ;;  %s824_s16 = sphi %s877_s16, %s996_s16   ;;  %s820_s15 = sphi %s875_s15, %s995_s15  }
   0x4   : > { %p25_p0 = scmp.ge.s32.totalorder %s24_s20, 2  ;;  %p682_p1 = scmp.ge.s32.totalorder %s836_s19, 1 }
   0x5   : > { %p185_p2 = scmp.lt.s32.totalorder %s836_s19, 5 }
   0x6   : > { %s1000_s20 = smov (%p25_p0, %s24_s20), 0  ;;  %s1002_s21 = smov (!%p25_p0, %s27_s21), %s832_s18 }
   0x7   : > { %p186_p3 = pnand %p682_p1, %p185_p2  ;;  %p29_p4 = scmp.ge.s32.totalorder %s1002_s21, 2 }
   0x8   : > { %p230_p5 = scmp.lt.s32.totalorder (!%p186_p3), %s824_s16, 1  ;;  %s691_s22 = sshll.u32 (!%p186_p3), %s820_s15, 7 }
   0x9   : > { %s1004_s21 = smov (%p29_p4, %s1002_s21), 0  ;;  %189 = sbr.rel (%p186_p3) target bundleno = 545 (0x221), region = 28 }
   0xa   : > { %s261_s23 = sshra.s32 (!%p186_p3), %s691_s22, 7  ;;  %s704_s24 = sadd.s32 (!%p186_p3), 128, %s691_s22 }
   0xb   : > { %s692_s25 = sshll.u32 (!%p186_p3), %s261_s23, 3  ;;  %p281_p6 = scmp.lt.s32.totalorder (!%p186_p3), %s704_s24, 128 }
   0xc   : > { %p288_p7 = scmp.eq.s32.totalorder (!%p186_p3), %s820_s15, 1  ;;  %s693_s5 = sadd.s32 (!%p186_p3), 4294967168, %s691_s22 }
   0xd   : > { %p267_p8 = scmp.gt.s32.totalorder (!%p186_p3), %s693_s5, 0  ;;  %p274_p9 = scmp.eq.s32.totalorder (!%p186_p3), %s820_s15, 0 }
   0xe   : > { %s1006_s16 = smov (!%p230_p5, %s824_s16), 1  ;;  %s1008_s24 = smov (!%p281_p6, %s704_s24), 128  ;;  %vm305_vm0 = vcmask 130048   ;;  %vm308_vm1 = vcmask 261120   ;;  %v839_v12 = vmov 0.0   ;;  %v310_v22 = vlaneseq }
   0xf   : > { %s702_s26 = sshll.u32 %s1006_s16, 4  ;;  %s283_s6 = sshra.s32 %s1008_s24, 7  ;;  %v924_v16 = vld [vmem:[%s987_s1] sm:$0xf]  ;;  %vm375_vm2 = vcmask 908288   ;;  %vm355_vm4 = vcmask 1043456  }
  0x10   : > { %s234_s29 = scalar_lea.vmem %s986_s0, %s702_s26  ;;  %s696_s7 = sshll.u32 %s283_s6, 3  ;;  %v396_v18 = vunpack.c.l.b16 %v924_v16  ;;  %v311_v24 = vand.u32 127, %v310_v22  ;;  %vm452_vm5 = vcmask 777216   ;;  %vm334_vm6 = vcmask 7168  }
  0x11   : > { %s264_s30 = scalar_lea.vmem %s234_s29, %s692_s25  ;;  %s286_s8 = scalar_lea.vmem %s234_s29, %s696_s7  ;;  %vm443_vm7 = vcmask 793600   ;;  %vm347_vm8 = vcmask 1039360   ;;  %vm461_vm10 = vcmask 785408   ;;  %vm365_vm11 = vcmask 924672  }
  0x12   : > { %v265_v0 = vld [vmem:[%s264_s30] sm:$0xff]  ;;  %s793_s9 = scalar_select %p288_p7, 0, 255  ;;  %v397_v20 = vpack.c.b16 %v396_v18, %v396_v18  ;;  %v316_v25 = vand.u32 15, %v311_v24  ;;  %vm400_vm12 = vcmask 195584   ;;  %vm389_vm13 = vcmask 916480  }
  0x13   : > { %s1010_s5 = smov (!%p267_p8, %s693_s5), 0  ;;  %s838_s12 = smov 16  }
  0x14   : > { %v794_v1 = vld [vmem:[%s286_s8] sm:%s793_s9]  ;;  %s269_s10 = sshra.s32 %s1010_s5, 7  ;;  %s840_s22 = smov 113   ;;  %vm927_vm3 = vcmp.le.s32.totalorder %v316_v25, 14  ;;  %vm939_vm9 = vcmp.ge.s32.totalorder %v316_v25, 1 }
  0x15   : > { %v757_v2 = vpack.i.bf16 %v794_v1, %v265_v0  ;;  %s694_s11 = sshll.u32 %s269_s10, 3  ;;  %s841_s23 = smov 95  }
  0x16   : > { %s796_s13 = scalar_select %p274_p9, 0, 255 }
  0x17   : > { %758 = vrot.lane.b32.xlu0 %v757_v2, %s838_s12  ;;  %s272_s14 = scalar_lea.vmem %s234_s29, %s694_s11  ;;  %s842_s24 = smov 1  }
  0x18   : > { %v797_v3 = vld [vmem:[%s272_s14] sm:%s796_s13]  ;;  %s843_s27 = smov 127   ;;  %s844_s28 = smov 96  }
  0x19   : > { %s845_s29 = smov 111   ;;  %s846_s30 = smov 80  }
  0x1a   : > { %s847_s5 = smov 97   ;;  %s848_s6 = smov 112  }
  0x1b   : > { %s849_s7 = smov 104   ;;  %p237_p10 = scmp.lt.s32.totalorder %s820_s15, 1 }
  0x1c   : > { %s685_s8 = sshll.u32 %s1006_s16, 1 }
  0x1d   : > { %s1012_s15 = smov (!%p237_p10, %s820_s15), 1 }
  0x1e   : > { %s240_s9 = sadd.s32 %s685_s8, %s1012_s15 }
  0x1f   : > { %294 = vrot.lane.b32.xlu0 %v797_v3, %s838_s12  ;;  %s686_s10 = sshll.u32 %s240_s9, 2  ;;  %s688_s14 = sshll.u32 %s240_s9, 3 }
  0x20   : > { %s242_s13 = scalar_lea.vmem %s988_s2, %s686_s10  ;;  %s250_s15 = scalar_lea.vmem %s989_s3, %s688_s14 }
  0x21   : > { %s258_s25 = scalar_lea.vmem %s990_s4, %s688_s14 }
  0x89   : > { %v759_v4 = vpop.permute.xlu0 %758 }
  0x8a   : > { %v761_v5 = vunpack.i.h.bf16 %v759_v4  ;;  %v760_v6 = vunpack.i.l.bf16 %v759_v4 }
  0x8c   : > { %v307_v7 = vsel %vm305_vm0, %v760_v6, %v761_v5 }
  0x8d   : > { %v309_v10 = vsel %vm308_vm1, %v307_v7, 0.0 }
  0x91   : > { %v295_v8 = vpop.permute.xlu0 %294 }
  0x92   : > { %v916_v9 = vsel %vm305_vm0, %v295_v8, %v760_v6 }
  0x93   : > { %v787_v11 = vpack.i.bf16 %v309_v10, %v916_v9  ;;  %v762_v13 = vpack.i.bf16 %v916_v9, %v839_v12  ;;  %v370_v14 = vpack.c.bf16 %v309_v10, %v916_v9  ;;  %v339_v48 = vpack.c.bf16 %v916_v9, %v916_v9 }
  0x95   : > { %788 = vrot.lane.b32.xlu0 %v787_v11, %s840_s22  ;;  %768 = vrot.lane.b32.xlu1 %v787_v11, %s841_s23  ;;  %v381_v15 = vunpack.c.l.b16 %v370_v14  ;;  %v382_v19 = vunpack.c.h.b16 %v370_v14  ;;  %v353_v60 = vunpack.c.l.b16 %v339_v48 }
  0x96   : > { %763 = vrot.lane.b32.xlu2 %v762_v13, %s842_s24 }
  0x97   : > { %v383_v17 = vpack.c.b16 %v381_v15, %v381_v15  ;;  %v384_v21 = vpack.c.b16 %v382_v19, %v382_v19  ;;  %v354_v4 = vpack.c.b16 %v353_v60, %v353_v60 }
  0x9d   : > { %773 = vrot.lane.b32.xlu1 %v787_v11, %s843_s27  ;;  %457 = vrot.lane.b32.xlu0 %v383_v17, %s844_s28 }
  0x9e   : > { %778 = vrot.lane.b32.xlu2 %v787_v11, %s845_s29 }
  0xa5   : > { %459 = vrot.lane.b32.xlu1 %v384_v21, %s844_s28  ;;  %467 = vrot.lane.b32.xlu0 %v397_v20, %s846_s30 }
  0xa6   : > { %783 = vrot.lane.b32.xlu2 %v787_v11, %s847_s5 }
  0xad   : > { %385 = vrot.lane.b32.xlu1 %v383_v17, %s848_s6 }
  0xae   : > { %387 = vrot.lane.b32.xlu2 %v384_v21, %s848_s6 }
  0xb5   : > { %398 = vrot.lane.b32.xlu1 %v397_v20, %s849_s7 }
  0xf0   : > { %v764_v23 = vpop.permute.xlu2 %763 }
  0xf1   : > { %v766_v41 = vunpack.i.h.bf16 %v764_v23  ;;  %v765_v42 = vunpack.i.l.bf16 %v764_v23 }
  0xf3   : > { %v335_v52 = vsel %vm334_vm6, %v765_v42, %v766_v41 }
  0xf4   : > { %v337_v57 = vsel %vm939_vm9, %v335_v52, 0.0 }
  0xf5   : > { %v338_v0 = vpack.c.bf16 %v337_v57, %v337_v57 }
  0xf7   : > { %v358_v7 = vsel %vm355_vm4, %v338_v0, %v354_v4 }
  0xf8   : > { %v779_v26 = vpop.permute.xlu2 %778 }
  0xf9   : > { %v781_v27 = vunpack.i.h.bf16 %v779_v26  ;;  %v780_v28 = vunpack.i.l.bf16 %v779_v26 }
  0xfb   : > { %v376_v30 = vsel %vm375_vm2, %v780_v28, %v781_v27 }
  0xfc   : > { %v378_v31 = vsel %vm927_vm3, %v376_v30, 0.0 }
  0xfd   : > { %v379_v32 = vpack.c.bf16 %v378_v31, %v378_v31 }
  0xff   : > { %v405_v33 = vsel %vm355_vm4, %v379_v32, 0 }
 0x100   : > { %413 = vmatpush.bf16.msra.mxu0 %v405_v33  ;;  %v784_v38 = vpop.permute.xlu2 %783 }
 0x101   : > { %v786_v44 = vunpack.i.h.bf16 %v784_v38  ;;  %v785_v45 = vunpack.i.l.bf16 %v784_v38 }
 0x103   : > { %v444_v53 = vsel %vm443_vm7, %v785_v45, %v786_v44 }
 0x104   : > { %v446_v59 = vsel %vm939_vm9, %v444_v53, 0.0 }
 0x105   : > { %v447_v2 = vpack.c.bf16 %v446_v59, %v446_v59 }
 0x107   : > { %v769_v34 = vpop.permute.xlu1 %768  ;;  %v789_v35 = vpop.permute.xlu0 %788 }
 0x108   : > { %v771_v36 = vunpack.i.h.bf16 %v769_v34  ;;  %v770_v37 = vunpack.i.l.bf16 %v769_v34  ;;  %v791_v61 = vunpack.i.h.bf16 %v789_v35  ;;  %v790_v62 = vunpack.i.l.bf16 %v789_v35  ;;  %v388_v10 = vpop.permute.xlu2 %387 }
 0x10a   : > { %v453_v39 = vsel %vm452_vm5, %v770_v37, %v771_v36  ;;  %v366_v6 = vsel %vm365_vm11, %v790_v62, %v791_v61 }
 0x10b   : > { %v455_v40 = vsel %vm927_vm3, %v453_v39, 0.0  ;;  %v368_v9 = vsel %vm939_vm9, %v366_v6, 0.0 }
 0x10c   : > { %v456_v43 = vpack.c.bf16 %v455_v40, %v455_v40  ;;  %v369_v12 = vpack.c.bf16 %v368_v9, %v368_v9 }
 0x10e   : > { %v473_v46 = vsel %vm355_vm4, %v456_v43, 0 }
 0x10f   : > { %v774_v47 = vpop.permute.xlu1 %773  ;;  %481 = vmatpush.bf16.msra.mxu2 %v473_v46  ;;  %v458_v54 = vpop.permute.xlu0 %457 }
 0x110   : > { %v776_v49 = vunpack.i.h.bf16 %v774_v47  ;;  %v775_v50 = vunpack.i.l.bf16 %v774_v47 }
 0x112   : > { %v348_v55 = vsel %vm347_vm8, %v775_v50, %v776_v49 }
 0x113   : > { %v350_v56 = vsel %vm927_vm3, %v348_v55, 0.0 }
 0x114   : > { %v351_v58 = vpack.c.bf16 %v350_v56, %v350_v56 }
 0x116   : > { %v424_v63 = vsel %vm355_vm4, %v351_v58, 0 }
 0x117   : > { %432 = vmatpush.bf16.msra.mxu1 %v424_v63  ;;  %v460_v1 = vpop.permute.xlu1 %459  ;;  %v468_v8 = vpop.permute.xlu0 %467 }
 0x118   : > { %v462_v3 = vsel %vm461_vm10, %v458_v54, %v460_v1 }
 0x119   : > { %v465_v5 = vsel %vm355_vm4, %v447_v2, %v462_v3 }
 0x11a   : > { %482 = vmatpush.bf16.msra.mxu2 %v465_v5 }
 0x11b   : > { %433 = vmatpush.bf16.msra.mxu1 %v358_v7 }
 0x11d   : > { %699 = vmatmul.msk.bf16.vlgmr.msra.gmra.mxu2 %vm400_vm12, %v468_v8 }
 0x11e   : > { %698 = vmatmul.msk.bf16.vlgmr.msra.gmra.mxu1 %vm400_vm12, %v924_v16 }
 0x11f   : > { %v386_v11 = vpop.permute.xlu1 %385 }
 0x120   : > { %v390_v13 = vsel %vm389_vm13, %v386_v11, %v388_v10 }
 0x121   : > { %v393_v14 = vsel %vm355_vm4, %v369_v12, %v390_v13 }
 0x122   : > { %414 = vmatpush.bf16.msra.mxu0 %v393_v14 }
 0x127   : > { %v399_v15 = vpop.permute.xlu1 %398 }
 0x128   : > { %697 = vmatmul.msk.bf16.vlgmr.msra.gmra.mxu0 %vm400_vm12, %v399_v15 }
 0x19b   : > { %v435_v17 = vpop.f32.mrf.mxu1 }
 0x1a0   : > { %v484_v18 = vpop.f32.mrf.mxu2 }
 0x1a3   : > { %v437_v19 = vpop.f32.mrf.mxu1 }
 0x1a5   : > { %v416_v20 = vpop.f32.mrf.mxu0 }
 0x1a6   : > { %v436_v21 = vadd.f32 %v435_v17, %v416_v20 }
 0x1a8   : > { %v488_v16 = vadd.f32 %v484_v18, %v436_v21  ;;  %v486_v22 = vpop.f32.mrf.mxu2 }
 0x1aa   : > { %v496_v23 = vpack.c.bf16 %v488_v16, %v488_v16  ;;  %489 = vadd.xlane.f32.xlu2 %v488_v16  ;;  %v492_v24 = vmul.f32 %v488_v16, %v488_v16 }
 0x1ac   : > { %493 = vadd.xlane.f32.xlu0 %v492_v24  ;;  %497 = vst [vmem:[%s242_s13] sm:$0xf] %v496_v23 }
 0x1ad   : > { %v418_v25 = vpop.f32.mrf.mxu0 }
 0x21d   : > { %v490_v26 = vpop.xlane.xlu2 %489 }
 0x21e   : > { %491 = vst.msk [vmem:[%s250_s15] sm:$0xff] %vm334_vm6, %v490_v26 }
 0x21f   : > { %v494_v27 = vpop.xlane.xlu0 %493 }
 0x220   : > { %495 = vst.msk [vmem:[%s258_s25] sm:$0xff] %vm334_vm6, %v494_v27 }
 0x221 PF: > { %s15_s19 = sadd.s32 1, %s836_s19   ;;  %s995_s15 = smov %s828_s17 }
 0x222   : > { %p12_p11 = scmp.ge.s32.totalorder %s15_s19, 6   ;;  %s996_s16 = smov %s832_s18 }
 0x223   : > { %s997_s17 = smov %s1000_s20  ;;  %s998_s18 = smov %s1004_s21 }
 0x224   :  { %14 = sbr.rel (!%p12_p11) target bundleno = 3 (0x3), region = 85 }

// kernel: residual_block_forward.4
= control target key start
LH: loop header
LB: loop body
LE: loop exit
PB: predicated region body
PF: predicated region fallthrough
CT: control target
= control target key end

     0   :  { %s960_s21 = smov 0   ;;  %s962_s22 = smov 0   ;;  %s1080_s0 = inlined_call_operand.vmem [shape: bf16[2,8,256], index: 0, kind: input, shape index: {}]   ;;  %s1081_s1 = inlined_call_operand.vmem [shape: bf16[8,72], index: 1, kind: input, shape index: {}]   ;;  %s1082_s2 = inlined_call_operand.vmem [shape: f32[8,1], index: 2, kind: input, shape index: {}]   ;;  %s1083_s3 = inlined_call_operand.vmem [shape: f32[8,1], index: 3, kind: input, shape index: {}]   ;;  %s1084_s4 = inlined_call_operand.vmem [shape: bf16[2,8,256], index: 4, kind: output, shape index: {0}]   ;;  %s1085_s5 = inlined_call_operand.vmem [shape: f32[2,2,8,1], index: 5, kind: output, shape index: {1}]   ;;  %s1086_s6 = inlined_call_operand.vmem [shape: f32[2,2,8,1], index: 6, kind: output, shape index: {2}]  }
   0x1   :  { %s964_s23 = smov 0   ;;  %s966_s24 = smov 0  }
   0x2   :  { %s968_s25 = smov 0  }
   0x3 LB: > { %s26_s26 = sadd.s32 1, %s902_s23  ;;  %s29_s27 = sadd.s32 1, %s906_s24  ;;  %s910_s25 = sphi %s968_s25, %s17_s25   ;;  %s906_s24 = sphi %s966_s24, %s1094_s24   ;;  %s902_s23 = sphi %s964_s23, %s1093_s23   ;;  %s898_s22 = sphi %s962_s22, %s1092_s22   ;;  %s894_s21 = sphi %s960_s21, %s1091_s21  }
   0x4   : > { %p27_p0 = scmp.ge.s32.totalorder %s26_s26, 2  ;;  %p760_p1 = scmp.ge.s32.totalorder %s910_s25, 1 }
   0x5   : > { %p235_p2 = scmp.lt.s32.totalorder %s910_s25, 5 }
   0x6   : > { %s1096_s26 = smov (%p27_p0, %s26_s26), 0  ;;  %s1098_s27 = smov (!%p27_p0, %s29_s27), %s906_s24 }
   0x7   : > { %p236_p3 = pnand %p760_p1, %p235_p2  ;;  %p31_p4 = scmp.ge.s32.totalorder %s1098_s27, 2 }
   0x8   : > { %s769_s8 = sshll.u32 (!%p236_p3), %s894_s21, 7  ;;  %p284_p6 = scmp.lt.s32.totalorder (!%p236_p3), %s898_s22, 1 }
   0x9   : > { %s1100_s27 = smov (%p31_p4, %s1098_s27), 0  ;;  %239 = sbr.rel (%p236_p3) target bundleno = 660 (0x294), region = 36 }
   0xa   : > { %s782_s9 = sadd.s32 (!%p236_p3), 128, %s769_s8  ;;  %s771_s10 = sadd.s32 (!%p236_p3), 4294967168, %s769_s8 }
   0xb   : > { %p355_p5 = scmp.lt.s32.totalorder (!%p236_p3), %s782_s9, 128  ;;  %p337_p7 = scmp.gt.s32.totalorder (!%p236_p3), %s771_s10, 0 }
   0xc   : > { %s317_s11 = sshra.s32 (!%p236_p3), %s769_s8, 7  ;;  %p366_p8 = scmp.eq.s32.totalorder (!%p236_p3), %s894_s21, 1 }
   0xd   : > { %s770_s14 = sshll.u32 (!%p236_p3), %s317_s11, 2  ;;  %p348_p9 = scmp.eq.s32.totalorder (!%p236_p3), %s894_s21, 0 }
   0xe   : > { %v314_v0 = vld [vmem:[%s1082_s2] sm:$0xff]  ;;  %v912_v1 = vmov 0   ;;  %s1102_s9 = smov (!%p355_p5, %s782_s9), 128  ;;  %s1104_s22 = smov (!%p284_p6, %s898_s22), 1  ;;  %vm383_vm2 = vcmask 130048   ;;  %vm386_vm3 = vcmask 261120   ;;  %v388_v43 = vlaneseq }
   0xf   : > { %836 = vset.pattern.permute.xlu0 %v912_v1  ;;  %v315_v2 = vld [vmem:[%s1083_s3] sm:$0xff]  ;;  %s357_s12 = sshra.s32 %s1102_s9, 7  ;;  %s780_s13 = sshll.u32 %s1104_s22, 3  ;;  %v914_v33 = vmov 0.0   ;;  %vm530_vm4 = vcmask 777216   ;;  %vm433_vm6 = vcmask 1043456  }
  0x10   : > { %325 = vperm.xlu0 %836, %v314_v0   ;;  %s1106_s10 = smov (!%p337_p7, %s771_s10), 0  ;;  %s774_s15 = sshll.u32 %s357_s12, 2  ;;  %v1015_v39 = vld [vmem:[%s1081_s1] sm:$0xf]  ;;  %v389_v44 = vand.u32 127, %v388_v43  ;;  %vm425_vm7 = vcmask 1039360  }
  0x11   : > { %s288_s18 = scalar_lea.vmem %s1080_s0, %s780_s13  ;;  %s339_s19 = sshra.s32 %s1106_s10, 7  ;;  %v474_v41 = vunpack.c.l.b16 %v1015_v39  ;;  %vm453_vm8 = vcmask 908288   ;;  %vm412_vm9 = vcmask 7168   ;;  %vm443_vm11 = vcmask 924672  }
  0x12   : > { %s320_s20 = scalar_lea.vmem %s288_s18, %s770_s14  ;;  %s360_s28 = scalar_lea.vmem %s288_s18, %s774_s15  ;;  %v394_v45 = vand.u32 15, %v389_v44  ;;  %vm521_vm12 = vcmask 793600   ;;  %vm478_vm13 = vcmask 195584   ;;  %vm539_vm14 = vcmask 785408  }
  0x13   : > { %s772_s29 = sshll.u32 %s339_s19, 2  ;;  %v321_v4 = vld [vmem:[%s320_s20] sm:$0xf]  ;;  %s913_s9 = smov 16   ;;  %v475_v42 = vpack.c.b16 %v474_v41, %v474_v41  ;;  %vm467_vm15 = vcmask 916480  }
  0x14   : > { %v361_v5 = vld [vmem:[%s360_s28] sm:$0xf]  ;;  %s342_s30 = scalar_lea.vmem %s288_s18, %s772_s29  ;;  %v322_v6 = vunpack.c.l.bf16 %v321_v4  ;;  %s915_s10 = smov 111   ;;  %vm1018_vm5 = vcmp.le.s32.totalorder %v394_v45, 14  ;;  %vm1032_vm10 = vcmp.ge.s32.totalorder %v394_v45, 1 }
  0x15   : > { %v362_v7 = vunpack.c.l.bf16 %v361_v5  ;;  %s367_s7 = scalar_select %p366_p8, 1, 0  ;;  %v343_v8 = vld [vmem:[%s342_s30] sm:$0xf] }
  0x16   : > { %v344_v13 = vunpack.c.l.bf16 %v343_v8  ;;  %s349_s8 = scalar_select %p348_p9, 1, 0 }
  0x17   : > { %v368_v11 = vstv %s367_s7  ;;  %s916_s11 = smov 95   ;;  %s917_s12 = smov 1  }
  0x18   : > { %331 = vperm.xlu0 %836, %v315_v2   ;;  %vm369_vm0 = vcmp.eq.s32.totalorder %v368_v11, 1  ;;  %v350_v22 = vstv %s349_s8  ;;  %s918_s13 = smov 127   ;;  %s919_s14 = smov 96  }
  0x19   : > { %vm351_vm1 = vcmp.eq.s32.totalorder %v350_v22, 1  ;;  %s920_s15 = smov 97   ;;  %s921_s18 = smov 113  }
  0x1a   : > { %s922_s19 = smov 112   ;;  %s923_s20 = smov 104  }
  0x1b   : > { %s924_s28 = smov 80   ;;  %p291_p10 = scmp.lt.s32.totalorder %s894_s21, 1 }
  0x1c   : > { %s763_s29 = sshll.u32 %s1104_s22, 1 }
  0x1d   : > { %s1108_s21 = smov (!%p291_p10, %s894_s21), 1 }
  0x1e   : > { %s294_s30 = sadd.s32 %s763_s29, %s1108_s21 }
  0x1f   : > { %s764_s7 = sshll.u32 %s294_s30, 2 }
  0x82   : > { %v326_v3 = vpop.permute.xlu0 %325 }
  0x83   : > { %v328_v9 = vmul.f32 %v326_v3, %v322_v6  ;;  %v363_v10 = vmul.f32 %v362_v7, %v326_v3  ;;  %v345_v18 = vmul.f32 %v344_v13, %v326_v3 }
  0x8a   : > { %v332_v12 = vpop.permute.xlu0 %331 }
  0x8b   : > { %v334_v14 = vadd.f32 %v332_v12, %v328_v9  ;;  %v364_v15 = vadd.f32 %v363_v10, %v332_v12  ;;  %v346_v21 = vadd.f32 %v345_v18, %v332_v12 }
  0x8d   : > { %v365_v16 = vmax.f32 %v364_v15, 0.0  ;;  %v335_v17 = vmax.f32 %v334_v14, 0.0  ;;  %v347_v23 = vmax.f32 %v346_v21, 0.0 }
  0x8f   : > { %v370_v19 = vsel %vm369_vm0, 0.0, %v365_v16  ;;  %v352_v24 = vsel %vm351_vm1, 0.0, %v347_v23 }
  0x90   : > { %v837_v20 = vpack.i.bf16 %v370_v19, %v335_v17 }
  0x92   : > { %838 = vrot.lane.b32.xlu1 %v837_v20, %s913_s9 }
  0x9a   : > { %372 = vrot.lane.b32.xlu1 %v352_v24, %s913_s9 }
 0x104   : > { %v839_v25 = vpop.permute.xlu1 %838 }
 0x105   : > { %v841_v26 = vunpack.i.h.bf16 %v839_v25  ;;  %v840_v27 = vunpack.i.l.bf16 %v839_v25 }
 0x107   : > { %v385_v28 = vsel %vm383_vm2, %v840_v27, %v841_v26 }
 0x108   : > { %v387_v31 = vsel %vm386_vm3, %v385_v28, 0.0 }
 0x10c   : > { %v373_v29 = vpop.permute.xlu1 %372 }
 0x10d   : > { %v1007_v30 = vsel %vm383_vm2, %v373_v29, %v840_v27 }
 0x10e   : > { %v857_v32 = vpack.i.bf16 %v387_v31, %v1007_v30  ;;  %v842_v34 = vpack.i.bf16 %v1007_v30, %v914_v33  ;;  %v448_v35 = vpack.c.bf16 %v387_v31, %v1007_v30  ;;  %v417_v61 = vpack.c.bf16 %v1007_v30, %v1007_v30 }
 0x110   : > { %858 = vrot.lane.b32.xlu0 %v857_v32, %s915_s10  ;;  %848 = vrot.lane.b32.xlu2 %v857_v32, %s916_s11  ;;  %v460_v36 = vunpack.c.h.b16 %v448_v35  ;;  %v459_v38 = vunpack.c.l.b16 %v448_v35  ;;  %v431_v5 = vunpack.c.l.b16 %v417_v61  ;;  %s296_s10 = scalar_lea.vmem %s1084_s4, %s764_s7  ;;  %s766_s11 = sshll.u32 %s294_s30, 3 }
 0x111   : > { %843 = vrot.lane.b32.xlu1 %v842_v34, %s917_s12  ;;  %s304_s21 = scalar_lea.vmem %s1085_s5, %s766_s11 }
 0x112   : > { %v462_v37 = vpack.c.b16 %v460_v36, %v460_v36  ;;  %v461_v40 = vpack.c.b16 %v459_v38, %v459_v38  ;;  %v432_v13 = vpack.c.b16 %v431_v5, %v431_v5 }
 0x118   : > { %853 = vrot.lane.b32.xlu2 %v857_v32, %s918_s13  ;;  %537 = vrot.lane.b32.xlu0 %v462_v37, %s919_s14 }
 0x119   : > { %863 = vrot.lane.b32.xlu1 %v857_v32, %s920_s15  ;;  %s312_s15 = scalar_lea.vmem %s1086_s6, %s766_s11 }
 0x120   : > { %868 = vrot.lane.b32.xlu2 %v857_v32, %s921_s18  ;;  %463 = vrot.lane.b32.xlu0 %v461_v40, %s922_s19 }
 0x121   : > { %465 = vrot.lane.b32.xlu1 %v462_v37, %s922_s19 }
 0x128   : > { %476 = vrot.lane.b32.xlu0 %v475_v42, %s923_s20  ;;  %535 = vrot.lane.b32.xlu2 %v461_v40, %s919_s14 }
 0x130   : > { %545 = vrot.lane.b32.xlu2 %v475_v42, %s924_s28 }
 0x16a   : > { %v849_v46 = vpop.permute.xlu2 %848 }
 0x16b   : > { %v851_v47 = vunpack.i.h.bf16 %v849_v46  ;;  %v850_v48 = vunpack.i.l.bf16 %v849_v46 }
 0x16d   : > { %v531_v50 = vsel %vm530_vm4, %v850_v48, %v851_v47 }
 0x16e   : > { %v533_v51 = vsel %vm1018_vm5, %v531_v50, 0.0 }
 0x16f   : > { %v534_v52 = vpack.c.bf16 %v533_v51, %v533_v51 }
 0x171   : > { %v551_v53 = vsel %vm433_vm6, %v534_v52, 0 }
 0x172   : > { %v854_v54 = vpop.permute.xlu2 %853  ;;  %559 = vmatpush.bf16.msra.mxu2 %v551_v53 }
 0x173   : > { %v856_v55 = vunpack.i.h.bf16 %v854_v54  ;;  %v855_v56 = vunpack.i.l.bf16 %v854_v54 }
 0x175   : > { %v426_v57 = vsel %vm425_vm7, %v855_v56, %v856_v55 }
 0x176   : > { %v428_v58 = vsel %vm1018_vm5, %v426_v57, 0.0 }
 0x177   : > { %v429_v59 = vpack.c.bf16 %v428_v58, %v428_v58 }
 0x179   : > { %v502_v60 = vsel %vm433_vm6, %v429_v59, 0 }
 0x17a   : > { %510 = vmatpush.bf16.msra.mxu1 %v502_v60  ;;  %v869_v62 = vpop.permute.xlu2 %868 }
 0x17b   : > { %v871_v14 = vunpack.i.h.bf16 %v869_v62  ;;  %v870_v15 = vunpack.i.l.bf16 %v869_v62 }
 0x17d   : > { %v444_v23 = vsel %vm443_vm11, %v870_v15, %v871_v14 }
 0x17e   : > { %v446_v27 = vsel %vm1032_vm10, %v444_v23, 0.0 }
 0x17f   : > { %v447_v33 = vpack.c.bf16 %v446_v27, %v446_v27 }
 0x182   : > { %v859_v63 = vpop.permute.xlu0 %858  ;;  %v536_v19 = vpop.permute.xlu2 %535 }
 0x183   : > { %v861_v0 = vunpack.i.h.bf16 %v859_v63  ;;  %v860_v1 = vunpack.i.l.bf16 %v859_v63  ;;  %v844_v2 = vpop.permute.xlu1 %843 }
 0x184   : > { %v846_v3 = vunpack.i.h.bf16 %v844_v2  ;;  %v845_v4 = vunpack.i.l.bf16 %v844_v2 }
 0x185   : > { %v454_v6 = vsel %vm453_vm8, %v860_v1, %v861_v0 }
 0x186   : > { %v456_v7 = vsel %vm1018_vm5, %v454_v6, 0.0  ;;  %v413_v9 = vsel %vm412_vm9, %v845_v4, %v846_v3 }
 0x187   : > { %v457_v10 = vpack.c.bf16 %v456_v7, %v456_v7  ;;  %v415_v11 = vsel %vm1032_vm10, %v413_v9, 0.0 }
 0x188   : > { %v416_v12 = vpack.c.bf16 %v415_v11, %v415_v11 }
 0x189   : > { %v483_v16 = vsel %vm433_vm6, %v457_v10, 0 }
 0x18a   : > { %491 = vmatpush.bf16.msra.mxu0 %v483_v16  ;;  %v538_v17 = vpop.permute.xlu0 %537  ;;  %v436_v18 = vsel %vm433_vm6, %v416_v12, %v432_v13  ;;  %v546_v32 = vpop.permute.xlu2 %545 }
 0x18b   : > { %v864_v20 = vpop.permute.xlu1 %863  ;;  %511 = vmatpush.bf16.msra.mxu1 %v436_v18  ;;  %v540_v28 = vsel %vm539_vm14, %v536_v19, %v538_v17 }
 0x18c   : > { %v866_v21 = vunpack.i.h.bf16 %v864_v20  ;;  %v865_v22 = vunpack.i.l.bf16 %v864_v20 }
 0x18e   : > { %v522_v24 = vsel %vm521_vm12, %v865_v22, %v866_v21  ;;  %776 = vmatmul.msk.bf16.vlgmr.msra.gmra.mxu1 %vm478_vm13, %v1015_v39 }
 0x18f   : > { %v524_v25 = vsel %vm1032_vm10, %v522_v24, 0.0 }
 0x190   : > { %v525_v26 = vpack.c.bf16 %v524_v25, %v524_v25 }
 0x192   : > { %v464_v29 = vpop.permute.xlu0 %463  ;;  %v543_v30 = vsel %vm433_vm6, %v525_v26, %v540_v28 }
 0x193   : > { %v466_v31 = vpop.permute.xlu1 %465  ;;  %560 = vmatpush.bf16.msra.mxu2 %v543_v30 }
 0x194   : > { %v468_v34 = vsel %vm467_vm15, %v464_v29, %v466_v31 }
 0x195   : > { %v471_v35 = vsel %vm433_vm6, %v447_v33, %v468_v34 }
 0x196   : > { %492 = vmatpush.bf16.msra.mxu0 %v471_v35  ;;  %777 = vmatmul.msk.bf16.vlgmr.msra.gmra.mxu2 %vm478_vm13, %v546_v32 }
 0x19a   : > { %v477_v36 = vpop.permute.xlu0 %476 }
 0x19b   : > { %775 = vmatmul.msk.bf16.vlgmr.msra.gmra.mxu0 %vm478_vm13, %v477_v36 }
 0x20b   : > { %v513_v37 = vpop.f32.mrf.mxu1 }
 0x213   : > { %v515_v38 = vpop.f32.mrf.mxu1 }
 0x218   : > { %v494_v39 = vpop.f32.mrf.mxu0 }
 0x219   : > { %v514_v40 = vadd.f32 %v513_v37, %v494_v39  ;;  %v562_v41 = vpop.f32.mrf.mxu2 }
 0x21b   : > { %v566_v42 = vadd.f32 %v562_v41, %v514_v40 }
 0x21d   : > { %v574_v43 = vpack.c.bf16 %v566_v42, %v566_v42  ;;  %567 = vadd.xlane.f32.xlu1 %v566_v42  ;;  %v570_v44 = vmul.f32 %v566_v42, %v566_v42 }
 0x21f   : > { %571 = vadd.xlane.f32.xlu2 %v570_v44  ;;  %575 = vst [vmem:[%s296_s10] sm:$0xf] %v574_v43 }
 0x220   : > { %v496_v45 = vpop.f32.mrf.mxu0 }
 0x221   : > { %v564_v46 = vpop.f32.mrf.mxu2 }
 0x290   : > { %v568_v47 = vpop.xlane.xlu1 %567 }
 0x291   : > { %569 = vst.msk [vmem:[%s304_s21] sm:$0xff] %vm412_vm9, %v568_v47 }
 0x292   : > { %v572_v48 = vpop.xlane.xlu2 %571 }
 0x293   : > { %573 = vst.msk [vmem:[%s312_s15] sm:$0xff] %vm412_vm9, %v572_v48 }
 0x294 PF: > { %s17_s25 = sadd.s32 1, %s910_s25   ;;  %s1091_s21 = smov %s902_s23 }
 0x295   : > { %p14_p11 = scmp.ge.s32.totalorder %s17_s25, 6   ;;  %s1092_s22 = smov %s906_s24 }
 0x296   : > { %s1093_s23 = smov %s1096_s26  ;;  %s1094_s24 = smov %s1100_s27 }
 0x297   :  { %16 = sbr.rel (!%p14_p11) target bundleno = 3 (0x3), region = 93 }

</bundles_post_ra>
